<compile_context>
chip_gen: v6e
topology: v6e:2x2x1
jax: 0.10.0
libtpu: 0.0.40
codegen_flags: <defaults>
</compile_context>

<pallas_src>
import functools

import jax
import jax.numpy as jnp
from jax import lax
from jax.experimental import pallas as pl
from jax.experimental.pallas import tpu as pltpu

BN_EPS = 1e-5


# ----------------------------- Pallas kernels ---------------------------------------

def _conv_bn_relu_kernel(w_ref, p_ref, g_ref, b_ref, o_ref, *, inv_m):
    # (Cout, Kp) @ (Kp, Mp): single-pass bf16 MXU matmul, f32 accumulation.
    acc = jnp.dot(w_ref[...], p_ref[...], preferred_element_type=jnp.float32)
    # Train-mode BatchNorm3d: stats over batch+spatial == the lane (M) axis here.
    # Padded M columns of `acc` are exactly zero (zero-padded patches), so sums over Mp
    # with the true-M divisor are exact.  One pass: var = E[x^2] - E[x]^2, then the BN
    # is folded into a single per-channel affine (scale, bias).
    mean = jnp.sum(acc, axis=1, keepdims=True) * inv_m                  # (Cout, 1)
    ex2 = jnp.sum(acc * acc, axis=1, keepdims=True) * inv_m             # (Cout, 1)
    var = jnp.maximum(ex2 - mean * mean, 0.0)
    scale = g_ref[...] * lax.rsqrt(var + BN_EPS)                        # (Cout, 1)
    bias = b_ref[...] - mean * scale
    o_ref[...] = jnp.maximum(acc * scale + bias, 0.0)                   # fused ReLU


def _conv_tanh_kernel(w_ref, p_ref, o_ref):
    acc = jnp.dot(w_ref[...], p_ref[...], preferred_element_type=jnp.float32)
    o_ref[...] = 0.5 * (jnp.tanh(acc) + 1.0)


_VMEM = pl.BlockSpec(memory_space=pltpu.MemorySpace.VMEM)


def _pallas_conv_bn_relu(wmat_t, patches_t, gamma, beta, m_true):
    cout = wmat_t.shape[0]
    mp = patches_t.shape[1]
    return pl.pallas_call(
        functools.partial(_conv_bn_relu_kernel, inv_m=1.0 / float(m_true)),
        out_shape=jax.ShapeDtypeStruct((cout, mp), jnp.float32),
        in_specs=[_VMEM, _VMEM, _VMEM, _VMEM],
        out_specs=_VMEM,
    )(wmat_t, patches_t, gamma, beta)


def _pallas_conv_tanh(wmat_t, patches_t):
    cout = wmat_t.shape[0]
    mp = patches_t.shape[1]
    return pl.pallas_call(
        _conv_tanh_kernel,
        out_shape=jax.ShapeDtypeStruct((cout, mp), jnp.float32),
        in_specs=[_VMEM, _VMEM],
        out_specs=_VMEM,
    )(wmat_t, patches_t)


# ----------------------------- JAX glue (im2col etc., CBDHW layout) -----------------

def _pad_axis_to(a, axis, mult):
    pad = (-a.shape[axis]) % mult
    if pad == 0:
        return a
    cfg = [(0, 0)] * a.ndim
    cfg[axis] = (0, pad)
    return jnp.pad(a, cfg)


def _im2col_cbdhw(xp, k):
    """xp: padded input (C, B, Dp, Hp, Wp) -> transposed patches (K=C*k^3, M=B*Do*Ho*Wo)."""
    C, B, Dp, Hp, Wp = xp.shape
    Do, Ho, Wo = Dp - k + 1, Hp - k + 1, Wp - k + 1
    cols = []
    for kd in range(k):
        for kh in range(k):
            for kw in range(k):
                cols.append(xp[:, :, kd:kd + Do, kh:kh + Ho, kw:kw + Wo])
    p = jnp.stack(cols, axis=1)                         # (C, k^3, B, Do, Ho, Wo)
    return p.reshape(C * k * k * k, B * Do * Ho * Wo), (B, Do, Ho, Wo)


def _dilate_cbdhw(x, s):
    if s == 1:
        return x
    C, B, D, H, W = x.shape
    out = jnp.zeros((C, B, (D - 1) * s + 1, (H - 1) * s + 1, (W - 1) * s + 1), x.dtype)
    return out.at[:, :, ::s, ::s, ::s].set(x)


def _conv3d_as_matmul_t(x, w, stride, padding):
    """x: (C, B, D, H, W); w: (Cout, Cin, k, k, k), PyTorch Conv3d layout (stride=1 only)."""
    assert stride == 1
    k = w.shape[2]
    xp = jnp.pad(x, ((0, 0), (0, 0)) + ((padding, padding),) * 3)
    pt, dims = _im2col_cbdhw(xp, k)
    wt = w.reshape(w.shape[0], -1)                      # (Cout, Cin*k^3)
    return pt, wt, dims


def _convtranspose3d_as_matmul_t(x, w, stride, padding):
    """x: (C, B, D, H, W); w: (Cin, Cout, k, k, k), PyTorch ConvTranspose3d layout.

    ConvTranspose3d == zero-dilate input by `stride`, pad by (k-1-padding), then a
    stride-1 conv with the spatially flipped, channel-swapped kernel."""
    # TODO(synk): stride-2 layers could use 8-phase decomposition to skip the ~7/8
    # structural zeros introduced by dilation; left as-is since the net is glue-bound.
    k = w.shape[2]
    xd = _dilate_cbdhw(x, stride)
    pad = k - 1 - padding
    xp = jnp.pad(xd, ((0, 0), (0, 0)) + ((pad, pad),) * 3)
    weq = jnp.flip(w, axis=(2, 3, 4)).transpose(1, 0, 2, 3, 4)   # (Cout, Cin, k, k, k)
    pt, dims = _im2col_cbdhw(xp, k)
    wt = weq.reshape(weq.shape[0], -1)                  # (Cout, Cin*k^3)
    return pt, wt, dims


# ----------------------------- Generator --------------------------------------------

def build_generator(num_layers, gf, gk, gs, gp, key):
    """Mirrors Generator.__init__: per-layer configs + deterministic params."""
    cfgs, weights, gammas, betas = [], [], [], []
    keys = jax.random.split(key, len(gk))
    for lay, (k, s, p) in enumerate(zip(gk, gs, gp)):
        cin, cout = gf[lay], gf[lay + 1]
        if lay < num_layers - 4:
            w = 0.05 * jax.random.normal(keys[lay], (cin, cout, k, k, k), jnp.float32)
            cfgs.append(dict(kind="convT", k=k, s=s, p=p))
        elif lay == num_layers - 4:
            w = 0.05 * jax.random.normal(keys[lay], (cout, cin, 4, 4, 4), jnp.float32)
            cfgs.append(dict(kind="conv", k=4, s=1, p=1))
        else:
            w = 0.05 * jax.random.normal(keys[lay], (cin, cout, 4, 4, 4), jnp.float32)
            cfgs.append(dict(kind="convT", k=4, s=2, p=2))
        weights.append(w)
        gammas.append(jnp.ones((cout,), jnp.float32))    # BatchNorm3d default weight
        betas.append(jnp.zeros((cout,), jnp.float32))    # BatchNorm3d default bias
    return cfgs, weights, gammas, betas


def generator_forward(x, weights, gammas, betas, cfgs):
    # TODO(synk): BatchNorm3d running-mean/var buffers are not tracked (train-mode
    # forward output does not depend on them).
    # TODO(synk): all five layers fit in VMEM; a fully fused single pallas_call with
    # in-kernel im2col would remove the remaining XLA glue + patch HBM round trips.
    n = len(cfgs)
    x = jnp.transpose(x, (1, 0, 2, 3, 4))               # NCDHW -> CBDHW, once at entry
    for i, cfg in enumerate(cfgs):
        if cfg["kind"] == "convT":
            pt, wt, (B, Do, Ho, Wo) = _convtranspose3d_as_matmul_t(
                x, weights[i], cfg["s"], cfg["p"])
        else:
            pt, wt, (B, Do, Ho, Wo) = _conv3d_as_matmul_t(
                x, weights[i], cfg["s"], cfg["p"])
        m = B * Do * Ho * Wo
        cout = wt.shape[0]
        # bf16 MXU inputs (f32 accumulation in-kernel).  Zero-pad K and M to multiples
        # of 128: contraction stays exact and the kernel output is lane-dense
        # (unmasked, full-width stores).
        pt = _pad_axis_to(_pad_axis_to(pt, 0, 128), 1, 128).astype(jnp.bfloat16)
        wt = _pad_axis_to(wt, 1, 128).astype(jnp.bfloat16)
        if i < n - 1:
            y = _pallas_conv_bn_relu(wt, pt,
                                     gammas[i].reshape(cout, 1),
                                     betas[i].reshape(cout, 1), m)
        else:
            y = _pallas_conv_tanh(wt, pt)
        x = y[:, :m].reshape(cout, B, Do, Ho, Wo)        # stays CBDHW for next layer
    return jnp.transpose(x, (1, 0, 2, 3, 4))             # back to NCDHW at exit


# ----------------------------- pure-JAX reference ------------------------------------

def _ref_forward(x, weights, gammas, betas, cfgs):
    n = len(cfgs)
    for i, cfg in enumerate(cfgs):
        w = weights[i]
        if cfg["kind"] == "convT":
            k, s, p = cfg["k"], cfg["s"], cfg["p"]
            wt = jnp.flip(w, axis=(2, 3, 4)).transpose(1, 0, 2, 3, 4)
            dn = lax.conv_dimension_numbers(x.shape, wt.shape, ("NCDHW", "OIDHW", "NCDHW"))
            y = lax.conv_general_dilated(x, wt, (1, 1, 1), [(k - 1 - p, k - 1 - p)] * 3,
                                         lhs_dilation=(s, s, s), dimension_numbers=dn,
                                         precision=lax.Precision.HIGHEST)
        else:
            s, p = cfg["s"], cfg["p"]
            dn = lax.conv_dimension_numbers(x.shape, w.shape, ("NCDHW", "OIDHW", "NCDHW"))
            y = lax.conv_general_dilated(x, w, (s, s, s), [(p, p)] * 3,
                                         dimension_numbers=dn,
                                         precision=lax.Precision.HIGHEST)
        if i < n - 1:
            mean = jnp.mean(y, axis=(0, 2, 3, 4), keepdims=True)
            var = jnp.mean((y - mean) ** 2, axis=(0, 2, 3, 4), keepdims=True)
            y = (y - mean) * lax.rsqrt(var + BN_EPS)
            y = y * gammas[i].reshape(1, -1, 1, 1, 1) + betas[i].reshape(1, -1, 1, 1, 1)
            y = jnp.maximum(y, 0.0)
        else:
            y = 0.5 * (jnp.tanh(y) + 1.0)
        x = y
    return x


# ----------------------------- main ---------------------------------------------------

if __name__ == "__main__":
    num_layers = 5
    gf = [8, 8, 8, 8, 4, 1]          # channels per stage (small, synthetic)
    gk = [4, 4, 4, 4, 4]
    gs = [1, 1, 2, 2, 2]
    gp = [0, 1, 2, 2, 2]

    key = jax.random.PRNGKey(0)
    kparams, kx = jax.random.split(key)
    cfgs, weights, gammas, betas = build_generator(num_layers, gf, gk, gs, gp, kparams)

    # latent input, NCDHW: (batch=2, C=gf[0], 1, 1, 1)
    x = jax.random.normal(kx, (2, gf[0], 1, 1, 1), jnp.float32)

    fwd = jax.jit(functools.partial(generator_forward, weights=weights, gammas=gammas,
                                    betas=betas, cfgs=cfgs))
    out = jax.block_until_ready(fwd(x))

    # spatial trace: 1 ->(CT 4,1,0) 4 ->(Conv 4,1,1) 3 ->(CT 4,2,2) 4 -> 6 -> 10
    assert out.shape == (2, gf[-1], 10, 10, 10), out.shape
    assert bool(jnp.all(jnp.isfinite(out)))

    ref = _ref_forward(x, weights, gammas, betas, cfgs)
    max_err = float(jnp.max(jnp.abs(out - ref)))
    assert max_err < 5e-2, f"mismatch vs reference: {max_err}"

    print("KERNEL_OK")
</pallas_src>

<mosaic_0001>
module attributes {stable_mosaic.version = 11 : i64} {
  func.func @_conv_bn_relu_kernel(%arg0: memref<8x512xbf16, #tpu.memory_space<vmem>>, %arg1: memref<512x128xbf16, #tpu.memory_space<vmem>>, %arg2: memref<8x1xf32, #tpu.memory_space<vmem>>, %arg3: memref<8x1xf32, #tpu.memory_space<vmem>>, %arg4: memref<8x128xf32, #tpu.memory_space<vmem>>) attributes {dimension_semantics = [], scalar_prefetch = 0 : i64, scratch_operands = 0 : i64, tpu.core_type = #tpu.core_type<tc>} {
    %c0 = arith.constant 0 : index
    %c0_0 = arith.constant 0 : index
    %0 = vector.load %arg0[%c0, %c0_0] : memref<8x512xbf16, #tpu.memory_space<vmem>>, vector<8x512xbf16>
    %c0_1 = arith.constant 0 : index
    %c0_2 = arith.constant 0 : index
    %1 = vector.load %arg1[%c0_1, %c0_2] : memref<512x128xbf16, #tpu.memory_space<vmem>>, vector<512x128xbf16>
    %cst = arith.constant dense<0.000000e+00> : vector<8x128xf32>
    %2 = tpu.matmul %0, %1, %cst {dimension_numbers = #tpu.dot_dimension_numbers<[1], [0], [0], [1], [0, 0, 1, 1], [], []>} : vector<8x512xbf16>, vector<512x128xbf16>, vector<8x128xf32> -> vector<8x128xf32>
    %cst_3 = arith.constant dense<0.000000e+00> : vector<8xf32>
    %3 = vector.multi_reduction <add>, %2, %cst_3 [1] : vector<8x128xf32> to vector<8xf32>
    %4 = vector.shape_cast %3 : vector<8xf32> to vector<8x1xf32>
    %cst_4 = arith.constant 7.812500e-03 : f32
    %5 = vector.broadcast %cst_4 : f32 to vector<8x1xf32>
    %6 = arith.mulf %4, %5 : vector<8x1xf32>
    %7 = arith.mulf %2, %2 : vector<8x128xf32>
    %cst_5 = arith.constant dense<0.000000e+00> : vector<8xf32>
    %8 = vector.multi_reduction <add>, %7, %cst_5 [1] : vector<8x128xf32> to vector<8xf32>
    %9 = vector.shape_cast %8 : vector<8xf32> to vector<8x1xf32>
    %cst_6 = arith.constant 7.812500e-03 : f32
    %10 = vector.broadcast %cst_6 : f32 to vector<8x1xf32>
    %11 = arith.mulf %9, %10 : vector<8x1xf32>
    %12 = arith.mulf %6, %6 : vector<8x1xf32>
    %13 = arith.subf %11, %12 : vector<8x1xf32>
    %cst_7 = arith.constant 0.000000e+00 : f32
    %14 = vector.broadcast %cst_7 : f32 to vector<8x1xf32>
    %15 = arith.maximumf %13, %14 : vector<8x1xf32>
    %c0_8 = arith.constant 0 : index
    %c0_9 = arith.constant 0 : index
    %16 = vector.load %arg2[%c0_8, %c0_9] : memref<8x1xf32, #tpu.memory_space<vmem>>, vector<8x1xf32>
    %cst_10 = arith.constant 9.99999974E-6 : f32
    %17 = vector.broadcast %cst_10 : f32 to vector<8x1xf32>
    %18 = arith.addf %15, %17 : vector<8x1xf32>
    %19 = math.rsqrt %18 : vector<8x1xf32>
    %20 = arith.mulf %16, %19 : vector<8x1xf32>
    %c0_11 = arith.constant 0 : index
    %c0_12 = arith.constant 0 : index
    %21 = vector.load %arg3[%c0_11, %c0_12] : memref<8x1xf32, #tpu.memory_space<vmem>>, vector<8x1xf32>
    %22 = arith.mulf %6, %20 : vector<8x1xf32>
    %23 = arith.subf %21, %22 : vector<8x1xf32>
    %24 = vector.broadcast %20 : vector<8x1xf32> to vector<8x128xf32>
    %25 = arith.mulf %2, %24 : vector<8x128xf32>
    %26 = vector.broadcast %23 : vector<8x1xf32> to vector<8x128xf32>
    %27 = arith.addf %25, %26 : vector<8x128xf32>
    %cst_13 = arith.constant 0.000000e+00 : f32
    %28 = vector.broadcast %cst_13 : f32 to vector<8x128xf32>
    %29 = arith.maximumf %27, %28 : vector<8x128xf32>
    %c0_14 = arith.constant 0 : index
    %c0_15 = arith.constant 0 : index
    %30 = vector.load %arg4[%c0_14, %c0_15] : memref<8x128xf32, #tpu.memory_space<vmem>>, vector<8x128xf32>
    tpu.vector_store %arg4[%c0_14, %c0_15], %29 {strides = array<i32>} : memref<8x128xf32, #tpu.memory_space<vmem>>, vector<8x128xf32>,
    return
  }
}

module attributes {stable_mosaic.version = 11 : i64} {
  func.func @_conv_bn_relu_kernel(%arg0: memref<8x512xbf16, #tpu.memory_space<vmem>>, %arg1: memref<512x128xbf16, #tpu.memory_space<vmem>>, %arg2: memref<8x1xf32, #tpu.memory_space<vmem>>, %arg3: memref<8x1xf32, #tpu.memory_space<vmem>>, %arg4: memref<8x128xf32, #tpu.memory_space<vmem>>) attributes {dimension_semantics = [], scalar_prefetch = 0 : i64, scratch_operands = 0 : i64, tpu.core_type = #tpu.core_type<tc>} {
    %c0 = arith.constant 0 : index
    %c0_0 = arith.constant 0 : index
    %0 = vector.load %arg0[%c0, %c0_0] : memref<8x512xbf16, #tpu.memory_space<vmem>>, vector<8x512xbf16>
    %c0_1 = arith.constant 0 : index
    %c0_2 = arith.constant 0 : index
    %1 = vector.load %arg1[%c0_1, %c0_2] : memref<512x128xbf16, #tpu.memory_space<vmem>>, vector<512x128xbf16>
    %cst = arith.constant dense<0.000000e+00> : vector<8x128xf32>
    %2 = tpu.matmul %0, %1, %cst {dimension_numbers = #tpu.dot_dimension_numbers<[1], [0], [0], [1], [0, 0, 1, 1], [], []>} : vector<8x512xbf16>, vector<512x128xbf16>, vector<8x128xf32> -> vector<8x128xf32>
    %cst_3 = arith.constant dense<0.000000e+00> : vector<8xf32>
    %3 = vector.multi_reduction <add>, %2, %cst_3 [1] : vector<8x128xf32> to vector<8xf32>
    %4 = vector.shape_cast %3 : vector<8xf32> to vector<8x1xf32>
    %cst_4 = arith.constant 0.0185185187 : f32
    %5 = vector.broadcast %cst_4 : f32 to vector<8x1xf32>
    %6 = arith.mulf %4, %5 : vector<8x1xf32>
    %7 = arith.mulf %2, %2 : vector<8x128xf32>
    %cst_5 = arith.constant dense<0.000000e+00> : vector<8xf32>
    %8 = vector.multi_reduction <add>, %7, %cst_5 [1] : vector<8x128xf32> to vector<8xf32>
    %9 = vector.shape_cast %8 : vector<8xf32> to vector<8x1xf32>
    %cst_6 = arith.constant 0.0185185187 : f32
    %10 = vector.broadcast %cst_6 : f32 to vector<8x1xf32>
    %11 = arith.mulf %9, %10 : vector<8x1xf32>
    %12 = arith.mulf %6, %6 : vector<8x1xf32>
    %13 = arith.subf %11, %12 : vector<8x1xf32>
    %cst_7 = arith.constant 0.000000e+00 : f32
    %14 = vector.broadcast %cst_7 : f32 to vector<8x1xf32>
    %15 = arith.maximumf %13, %14 : vector<8x1xf32>
    %c0_8 = arith.constant 0 : index
    %c0_9 = arith.constant 0 : index
    %16 = vector.load %arg2[%c0_8, %c0_9] : memref<8x1xf32, #tpu.memory_space<vmem>>, vector<8x1xf32>
    %cst_10 = arith.constant 9.99999974E-6 : f32
    %17 = vector.broadcast %cst_10 : f32 to vector<8x1xf32>
    %18 = arith.addf %15, %17 : vector<8x1xf32>
    %19 = math.rsqrt %18 : vector<8x1xf32>
    %20 = arith.mulf %16, %19 : vector<8x1xf32>
    %c0_11 = arith.constant 0 : index
    %c0_12 = arith.constant 0 : index
    %21 = vector.load %arg3[%c0_11, %c0_12] : memref<8x1xf32, #tpu.memory_space<vmem>>, vector<8x1xf32>
    %22 = arith.mulf %6, %20 : vector<8x1xf32>
    %23 = arith.subf %21, %22 : vector<8x1xf32>
    %24 = vector.broadcast %20 : vector<8x1xf32> to vector<8x128xf32>
    %25 = arith.mulf %2, %24 : vector<8x128xf32>
    %26 = vector.broadcast %23 : vector<8x1xf32> to vector<8x128xf32>
    %27 = arith.addf %25, %26 : vector<8x128xf32>
    %cst_13 = arith.constant 0.000000e+00 : f32
    %28 = vector.broadcast %cst_13 : f32 to vector<8x128xf32>
    %29 = arith.maximumf %27, %28 : vector<8x128xf32>
    %c0_14 = arith.constant 0 : index
    %c0_15 = arith.constant 0 : index
    %30 = vector.load %arg4[%c0_14, %c0_15] : memref<8x128xf32, #tpu.memory_space<vmem>>, vector<8x128xf32>
    tpu.vector_store %arg4[%c0_14, %c0_15], %29 {strides = array<i32>} : memref<8x128xf32, #tpu.memory_space<vmem>>, vector<8x128xf32>,
    return
  }
}

module attributes {stable_mosaic.version = 11 : i64} {
  func.func @_conv_bn_relu_kernel(%arg0: memref<4x512xbf16, #tpu.memory_space<vmem>>, %arg1: memref<512x512xbf16, #tpu.memory_space<vmem>>, %arg2: memref<4x1xf32, #tpu.memory_space<vmem>>, %arg3: memref<4x1xf32, #tpu.memory_space<vmem>>, %arg4: memref<4x512xf32, #tpu.memory_space<vmem>>) attributes {dimension_semantics = [], scalar_prefetch = 0 : i64, scratch_operands = 0 : i64, tpu.core_type = #tpu.core_type<tc>} {
    %c0 = arith.constant 0 : index
    %c0_0 = arith.constant 0 : index
    %0 = vector.load %arg0[%c0, %c0_0] : memref<4x512xbf16, #tpu.memory_space<vmem>>, vector<4x512xbf16>
    %c0_1 = arith.constant 0 : index
    %c0_2 = arith.constant 0 : index
    %1 = vector.load %arg1[%c0_1, %c0_2] : memref<512x512xbf16, #tpu.memory_space<vmem>>, vector<512x512xbf16>
    %cst = arith.constant dense<0.000000e+00> : vector<4x512xf32>
    %2 = tpu.matmul %0, %1, %cst {dimension_numbers = #tpu.dot_dimension_numbers<[1], [0], [0], [1], [0, 0, 1, 1], [], []>} : vector<4x512xbf16>, vector<512x512xbf16>, vector<4x512xf32> -> vector<4x512xf32>
    %cst_3 = arith.constant dense<0.000000e+00> : vector<4xf32>
    %3 = vector.multi_reduction <add>, %2, %cst_3 [1] : vector<4x512xf32> to vector<4xf32>
    %4 = vector.shape_cast %3 : vector<4xf32> to vector<4x1xf32>
    %cst_4 = arith.constant 0.00231481483 : f32
    %5 = vector.broadcast %cst_4 : f32 to vector<4x1xf32>
    %6 = arith.mulf %4, %5 : vector<4x1xf32>
    %7 = arith.mulf %2, %2 : vector<4x512xf32>
    %cst_5 = arith.constant dense<0.000000e+00> : vector<4xf32>
    %8 = vector.multi_reduction <add>, %7, %cst_5 [1] : vector<4x512xf32> to vector<4xf32>
    %9 = vector.shape_cast %8 : vector<4xf32> to vector<4x1xf32>
    %cst_6 = arith.constant 0.00231481483 : f32
    %10 = vector.broadcast %cst_6 : f32 to vector<4x1xf32>
    %11 = arith.mulf %9, %10 : vector<4x1xf32>
    %12 = arith.mulf %6, %6 : vector<4x1xf32>
    %13 = arith.subf %11, %12 : vector<4x1xf32>
    %cst_7 = arith.constant 0.000000e+00 : f32
    %14 = vector.broadcast %cst_7 : f32 to vector<4x1xf32>
    %15 = arith.maximumf %13, %14 : vector<4x1xf32>
    %c0_8 = arith.constant 0 : index
    %c0_9 = arith.constant 0 : index
    %16 = vector.load %arg2[%c0_8, %c0_9] : memref<4x1xf32, #tpu.memory_space<vmem>>, vector<4x1xf32>
    %cst_10 = arith.constant 9.99999974E-6 : f32
    %17 = vector.broadcast %cst_10 : f32 to vector<4x1xf32>
    %18 = arith.addf %15, %17 : vector<4x1xf32>
    %19 = math.rsqrt %18 : vector<4x1xf32>
    %20 = arith.mulf %16, %19 : vector<4x1xf32>
    %c0_11 = arith.constant 0 : index
    %c0_12 = arith.constant 0 : index
    %21 = vector.load %arg3[%c0_11, %c0_12] : memref<4x1xf32, #tpu.memory_space<vmem>>, vector<4x1xf32>
    %22 = arith.mulf %6, %20 : vector<4x1xf32>
    %23 = arith.subf %21, %22 : vector<4x1xf32>
    %24 = vector.broadcast %20 : vector<4x1xf32> to vector<4x512xf32>
    %25 = arith.mulf %2, %24 : vector<4x512xf32>
    %26 = vector.broadcast %23 : vector<4x1xf32> to vector<4x512xf32>
    %27 = arith.addf %25, %26 : vector<4x512xf32>
    %cst_13 = arith.constant 0.000000e+00 : f32
    %28 = vector.broadcast %cst_13 : f32 to vector<4x512xf32>
    %29 = arith.maximumf %27, %28 : vector<4x512xf32>
    %c0_14 = arith.constant 0 : index
    %c0_15 = arith.constant 0 : index
    %30 = vector.load %arg4[%c0_14, %c0_15] : memref<4x512xf32, #tpu.memory_space<vmem>>, vector<4x512xf32>
    tpu.vector_store %arg4[%c0_14, %c0_15], %29 {strides = array<i32>} : memref<4x512xf32, #tpu.memory_space<vmem>>, vector<4x512xf32>,
    return
  }
}

module attributes {stable_mosaic.version = 11 : i64} {
  func.func @_conv_tanh_kernel(%arg0: memref<1x256xbf16, #tpu.memory_space<vmem>>, %arg1: memref<256x2048xbf16, #tpu.memory_space<vmem>>, %arg2: memref<1x2048xf32, #tpu.memory_space<vmem>>) attributes {dimension_semantics = [], scalar_prefetch = 0 : i64, scratch_operands = 0 : i64, tpu.core_type = #tpu.core_type<tc>} {
    %c0 = arith.constant 0 : index
    %c0_0 = arith.constant 0 : index
    %0 = vector.load %arg0[%c0, %c0_0] : memref<1x256xbf16, #tpu.memory_space<vmem>>, vector<1x256xbf16>
    %c0_1 = arith.constant 0 : index
    %c0_2 = arith.constant 0 : index
    %1 = vector.load %arg1[%c0_1, %c0_2] : memref<256x2048xbf16, #tpu.memory_space<vmem>>, vector<256x2048xbf16>
    %cst = arith.constant dense<0.000000e+00> : vector<1x2048xf32>
    %2 = tpu.matmul %0, %1, %cst {dimension_numbers = #tpu.dot_dimension_numbers<[1], [0], [0], [1], [0, 0, 1, 1], [], []>} : vector<1x256xbf16>, vector<256x2048xbf16>, vector<1x2048xf32> -> vector<1x2048xf32>
    %3 = math.tanh %2 : vector<1x2048xf32>
    %cst_3 = arith.constant 1.000000e+00 : f32
    %4 = vector.broadcast %cst_3 : f32 to vector<1x2048xf32>
    %5 = arith.addf %3, %4 : vector<1x2048xf32>
    %cst_4 = arith.constant 5.000000e-01 : f32
    %6 = vector.broadcast %cst_4 : f32 to vector<1x2048xf32>
    %7 = arith.mulf %6, %5 : vector<1x2048xf32>
    %c0_5 = arith.constant 0 : index
    %c0_6 = arith.constant 0 : index
    %8 = vector.load %arg2[%c0_5, %c0_6] : memref<1x2048xf32, #tpu.memory_space<vmem>>, vector<1x2048xf32>
    tpu.vector_store %arg2[%c0_5, %c0_6], %7 {strides = array<i32>} : memref<1x2048xf32, #tpu.memory_space<vmem>>, vector<1x2048xf32>,
    return
  }
}

</mosaic_0001>

<bundles_post_ra>
// kernel: generator_forward.5
= control target key start
LH: loop header
LB: loop body
LE: loop exit
PB: predicated region body
PF: predicated region fallthrough
CT: control target
= control target key end

     0   :  { %v526_v50 = vmov 0   ;;  %s663_s1 = inlined_call_operand.vmem [shape: bf16[512,128], index: 1, kind: input, shape index: {}]   ;;  %s664_s0 = inlined_call_operand.vmem [shape: bf16[8,512], index: 0, kind: input, shape index: {}]   ;;  %s665_s2 = inlined_call_operand.vmem [shape: f32[8,1], index: 2, kind: input, shape index: {}]   ;;  %s666_s3 = inlined_call_operand.vmem [shape: f32[8,1], index: 3, kind: input, shape index: {}]   ;;  %s667_s4 = inlined_call_operand.vmem [shape: f32[8,128], index: 4, kind: output, shape index: {}]  }
   0x1   :  { %v488_v0 = vld [vmem:[%s663_s1 + $0x78] sm:$0xff]   ;;  %v492_v4 = vld [vmem:[%s663_s1 + $0x70] sm:$0xff]   ;;  %v496_v8 = vld [vmem:[%s663_s1 + $0x68] sm:$0xff]   ;;  %486 = vset.pattern.permute.xlu1 %v526_v50  ;;  %487 = vset.pattern.permute.xlu0 %v526_v50 }
   0x2   :  { %v489_v1 = vld [vmem:[%s663_s1 + $0xf8] sm:$0xff]   ;;  %441 = vmatprep.subr.bf16.mxu0 %v488_v0  ;;  %v493_v5 = vld [vmem:[%s663_s1 + $0xf0] sm:$0xff]   ;;  %v497_v9 = vld [vmem:[%s663_s1 + $0xe8] sm:$0xff]  }
   0x3   :  { %v490_v2 = vld [vmem:[%s663_s1 + $0x38] sm:$0xff]   ;;  %463 = vmatprep.subr.bf16.mxu1 %v489_v1  ;;  %v494_v6 = vld [vmem:[%s663_s1 + $0x30] sm:$0xff]   ;;  %v498_v10 = vld [vmem:[%s663_s1 + $0x28] sm:$0xff]  }
   0x4   :  { %v491_v3 = vld [vmem:[%s663_s1 + $0xb8] sm:$0xff]   ;;  %442 = vmatpush3.bf16.msra.mxu0 %v490_v2  ;;  %v495_v7 = vld [vmem:[%s663_s1 + $0xb0] sm:$0xff]   ;;  %v499_v11 = vld [vmem:[%s663_s1 + $0xa8] sm:$0xff]  }
   0x5   :  { %464 = vmatpush3.bf16.msra.mxu1 %v491_v3  ;;  %443 = vmatprep.subr.bf16.mxu0 %v492_v4  ;;  %v500_v12 = vld [vmem:[%s663_s1 + $0x60] sm:$0xff]   ;;  %v504_v16 = vld [vmem:[%s663_s1 + $0x58] sm:$0xff]   ;;  %v508_v20 = vld [vmem:[%s663_s1 + $0x50] sm:$0xff]  }
   0x6   :  { %465 = vmatprep.subr.bf16.mxu1 %v493_v5  ;;  %v501_v13 = vld [vmem:[%s663_s1 + $0xe0] sm:$0xff]   ;;  %v505_v17 = vld [vmem:[%s663_s1 + $0xd8] sm:$0xff]   ;;  %v509_v21 = vld [vmem:[%s663_s1 + $0xd0] sm:$0xff]  }
   0x7   :  { %v502_v14 = vld [vmem:[%s663_s1 + $0x20] sm:$0xff]   ;;  %v506_v18 = vld [vmem:[%s663_s1 + $0x18] sm:$0xff]   ;;  %v510_v22 = vld [vmem:[%s663_s1 + $0x10] sm:$0xff]  }
   0x8   :  { %444 = vmatpush3.bf16.msra.mxu0 %v494_v6  ;;  %v503_v15 = vld [vmem:[%s663_s1 + $0xa0] sm:$0xff]   ;;  %v507_v19 = vld [vmem:[%s663_s1 + $0x98] sm:$0xff]   ;;  %v511_v23 = vld [vmem:[%s663_s1 + $0x90] sm:$0xff]  }
   0x9   :  { %466 = vmatpush3.bf16.msra.mxu1 %v495_v7  ;;  %445 = vmatprep.subr.bf16.mxu0 %v496_v8  ;;  %v512_v24 = vld [vmem:[%s663_s1 + $0x48] sm:$0xff]   ;;  %v516_v28 = vld [vmem:[%s663_s1 + $0x40] sm:$0xff]  }
   0xa   :  { %467 = vmatprep.subr.bf16.mxu1 %v497_v9  ;;  %v513_v25 = vld [vmem:[%s663_s1 + $0xc8] sm:$0xff]   ;;  %v517_v29 = vld [vmem:[%s663_s1 + $0xc0] sm:$0xff]  }
   0xb   :  { %v514_v26 = vld [vmem:[%s663_s1 + $0x8] sm:$0xff]   ;;  %v518_v30 = vld [vmem:[%s663_s1] sm:$0xff]  }
   0xc   :  { %446 = vmatpush3.bf16.msra.mxu0 %v498_v10  ;;  %v515_v27 = vld [vmem:[%s663_s1 + $0x88] sm:$0xff]   ;;  %v519_v31 = vld [vmem:[%s663_s1 + $0x80] sm:$0xff]  }
   0xd   :  { %468 = vmatpush3.bf16.msra.mxu1 %v499_v11  ;;  %447 = vmatprep.subr.bf16.mxu0 %v500_v12  ;;  %v18_v32 = vld [vmem:[%s664_s0] sm:$0xff]  ;;  %v19_v33 = vld [vmem:[%s664_s0 + $0x8] sm:$0xff] }
   0xe   :  { %469 = vmatprep.subr.bf16.mxu1 %v501_v13  ;;  %v405_v34 = vcombine.low %v18_v32, %v18_v32  ;;  %v406_v35 = vcombine.high %v18_v32, %v18_v32  ;;  %v407_v36 = vcombine.low %v19_v33, %v19_v33  ;;  %v408_v37 = vcombine.high %v19_v33, %v19_v33  ;;  %v380_v59 = vld [vmem:[%s665_s2] sm:$0xff] }
   0xf   :  { %v384_v62 = vld [vmem:[%s666_s3] sm:$0xff] }
  0x10   :  { %448 = vmatpush3.bf16.msra.mxu0 %v502_v14  ;;  %322 = vmatprep.mubr.bf16.mxu0 %v406_v35 }
  0x11   :  { %470 = vmatpush3.bf16.msra.mxu1 %v503_v15  ;;  %449 = vmatprep.subr.bf16.mxu0 %v504_v16 }
  0x12   :  { %471 = vmatprep.subr.bf16.mxu1 %v505_v17  ;;  %362 = vmatprep.mubr.bf16.mxu1 %v408_v37 }
  0x14   :  { %450 = vmatpush3.bf16.msra.mxu0 %v506_v18 }
  0x15   :  { %472 = vmatpush3.bf16.msra.mxu1 %v507_v19  ;;  %451 = vmatprep.subr.bf16.mxu0 %v508_v20 }
  0x16   :  { %473 = vmatprep.subr.bf16.mxu1 %v509_v21 }
  0x18   :  { %452 = vmatpush3.bf16.msra.mxu0 %v510_v22 }
  0x19   :  { %474 = vmatpush3.bf16.msra.mxu1 %v511_v23  ;;  %453 = vmatprep.subr.bf16.mxu0 %v512_v24 }
  0x1a   :  { %475 = vmatprep.subr.bf16.mxu1 %v513_v25 }
  0x1c   :  { %454 = vmatpush3.bf16.msra.mxu0 %v514_v26 }
  0x1d   :  { %476 = vmatpush3.bf16.msra.mxu1 %v515_v27  ;;  %455 = vmatprep.subr.bf16.mxu0 %v516_v28 }
  0x1e   :  { %477 = vmatprep.subr.bf16.mxu1 %v517_v29 }
  0x20   :  { %456 = vmatpush3.bf16.msra.mxu0 %v518_v30 }
  0x21   :  { %478 = vmatpush3.bf16.msra.mxu1 %v519_v31 }
  0x23   :  { %323 = vmatmul.mubr.bf16.vlgmr.msra.gmra.mxu0 %v405_v34 }
  0x24   :  { %363 = vmatmul.mubr.bf16.vlgmr.msra.gmra.mxu1 %v407_v36 }
  0xe3   :  { %v457_v38 = vpop.f32.mrf.mxu0 }
  0xe4   :  { %v479_v39 = vpop.f32.mrf.mxu1 }
  0xe5   :  { %v458_v40 = vpop.f32.mrf.mxu0 }
  0xe6   :  { %v480_v41 = vpop.f32.mrf.mxu1  ;;  %v459_v42 = vadd.f32 %v458_v40, %v457_v38 }
  0xe7   :  { %v481_v43 = vadd.f32 %v480_v41, %v479_v39  ;;  %v460_v44 = vpop.f32.mrf.mxu0 }
  0xe8   :  { %v482_v45 = vpop.f32.mrf.mxu1 }
  0xe9   :  { %v365_v46 = vadd.f32 %v481_v43, %v459_v42  ;;  %v461_v47 = vpop.f32.mrf.mxu0 }
  0xea   :  { %v483_v48 = vpop.f32.mrf.mxu1 }
  0xeb   :  { %370 = vadd.xlane.f32.xlu0 %v365_v46  ;;  %v373_v49 = vmul.f32 %v365_v46, %v365_v46 }
  0xef   :  { %374 = vadd.xlane.f32.xlu0 %v373_v49 }
 0x174   :  { %v371_v51 = vpop.xlane.xlu0 %370 }
 0x175   :  { %v372_v52 = vmul.f32 0.0078125, %v371_v51 }
 0x177   :  { %v377_v54 = vmul.f32 %v372_v52, %v372_v52 }
 0x178   :  { %v375_v53 = vpop.xlane.xlu0 %374 }
 0x179   :  { %v376_v55 = vmul.f32 0.0078125, %v375_v53 }
 0x17b   :  { %v378_v56 = vsub.f32 %v376_v55, %v377_v54 }
 0x17d   :  { %v379_v57 = vmax.f32 %v378_v56, 0.0 }
 0x17f   :  { %v381_v58 = vadd.f32 1e-05, %v379_v57 }
 0x181   :  { %524 = vrsqrt.f32 %v381_v58 }
 0x18e   :  { %v525_v60 = vpop.eup %524 }
 0x18f   :  { %v383_v61 = vmul.f32 %v525_v60, %v380_v59 }
 0x191   :  { %389 = vperm.xlu1 %486, %v383_v61   ;;  %v385_v63 = vmul.f32 %v383_v61, %v372_v52 }
 0x193   :  { %v386_v0 = vsub.f32 %v384_v62, %v385_v63 }
 0x195   :  { %395 = vperm.xlu1 %486, %v386_v0  }
 0x20c   :  { %v390_v1 = vpop.permute.xlu1 %389 }
 0x20d   :  { %v392_v2 = vmul.f32 %v390_v1, %v365_v46 }
 0x210   :  { %v396_v3 = vpop.permute.xlu1 %395 }
 0x211   :  { %v398_v4 = vadd.f32 %v396_v3, %v392_v2 }
 0x213   :  { %v399_v5 = vmax.f32 %v398_v4, 0.0 }
 0x215   :  { %400 = vst [vmem:[%s667_s4] sm:$0xff] %v399_v5 }

// kernel: generator_forward.6
= control target key start
LH: loop header
LB: loop body
LE: loop exit
PB: predicated region body
PF: predicated region fallthrough
CT: control target
= control target key end

     0   :  { %v526_v50 = vmov 0   ;;  %s663_s1 = inlined_call_operand.vmem [shape: bf16[512,128], index: 1, kind: input, shape index: {}]   ;;  %s664_s0 = inlined_call_operand.vmem [shape: bf16[8,512], index: 0, kind: input, shape index: {}]   ;;  %s665_s2 = inlined_call_operand.vmem [shape: f32[8,1], index: 2, kind: input, shape index: {}]   ;;  %s666_s3 = inlined_call_operand.vmem [shape: f32[8,1], index: 3, kind: input, shape index: {}]   ;;  %s667_s4 = inlined_call_operand.vmem [shape: f32[8,128], index: 4, kind: output, shape index: {}]  }
   0x1   :  { %v488_v0 = vld [vmem:[%s663_s1 + $0x78] sm:$0xff]   ;;  %v492_v4 = vld [vmem:[%s663_s1 + $0x70] sm:$0xff]   ;;  %v496_v8 = vld [vmem:[%s663_s1 + $0x68] sm:$0xff]   ;;  %486 = vset.pattern.permute.xlu1 %v526_v50  ;;  %487 = vset.pattern.permute.xlu0 %v526_v50 }
   0x2   :  { %v489_v1 = vld [vmem:[%s663_s1 + $0xf8] sm:$0xff]   ;;  %441 = vmatprep.subr.bf16.mxu0 %v488_v0  ;;  %v493_v5 = vld [vmem:[%s663_s1 + $0xf0] sm:$0xff]   ;;  %v497_v9 = vld [vmem:[%s663_s1 + $0xe8] sm:$0xff]  }
   0x3   :  { %v490_v2 = vld [vmem:[%s663_s1 + $0x38] sm:$0xff]   ;;  %463 = vmatprep.subr.bf16.mxu1 %v489_v1  ;;  %v494_v6 = vld [vmem:[%s663_s1 + $0x30] sm:$0xff]   ;;  %v498_v10 = vld [vmem:[%s663_s1 + $0x28] sm:$0xff]  }
   0x4   :  { %v491_v3 = vld [vmem:[%s663_s1 + $0xb8] sm:$0xff]   ;;  %442 = vmatpush3.bf16.msra.mxu0 %v490_v2  ;;  %v495_v7 = vld [vmem:[%s663_s1 + $0xb0] sm:$0xff]   ;;  %v499_v11 = vld [vmem:[%s663_s1 + $0xa8] sm:$0xff]  }
   0x5   :  { %464 = vmatpush3.bf16.msra.mxu1 %v491_v3  ;;  %443 = vmatprep.subr.bf16.mxu0 %v492_v4  ;;  %v500_v12 = vld [vmem:[%s663_s1 + $0x60] sm:$0xff]   ;;  %v504_v16 = vld [vmem:[%s663_s1 + $0x58] sm:$0xff]   ;;  %v508_v20 = vld [vmem:[%s663_s1 + $0x50] sm:$0xff]  }
   0x6   :  { %465 = vmatprep.subr.bf16.mxu1 %v493_v5  ;;  %v501_v13 = vld [vmem:[%s663_s1 + $0xe0] sm:$0xff]   ;;  %v505_v17 = vld [vmem:[%s663_s1 + $0xd8] sm:$0xff]   ;;  %v509_v21 = vld [vmem:[%s663_s1 + $0xd0] sm:$0xff]  }
   0x7   :  { %v502_v14 = vld [vmem:[%s663_s1 + $0x20] sm:$0xff]   ;;  %v506_v18 = vld [vmem:[%s663_s1 + $0x18] sm:$0xff]   ;;  %v510_v22 = vld [vmem:[%s663_s1 + $0x10] sm:$0xff]  }
   0x8   :  { %444 = vmatpush3.bf16.msra.mxu0 %v494_v6  ;;  %v503_v15 = vld [vmem:[%s663_s1 + $0xa0] sm:$0xff]   ;;  %v507_v19 = vld [vmem:[%s663_s1 + $0x98] sm:$0xff]   ;;  %v511_v23 = vld [vmem:[%s663_s1 + $0x90] sm:$0xff]  }
   0x9   :  { %466 = vmatpush3.bf16.msra.mxu1 %v495_v7  ;;  %445 = vmatprep.subr.bf16.mxu0 %v496_v8  ;;  %v512_v24 = vld [vmem:[%s663_s1 + $0x48] sm:$0xff]   ;;  %v516_v28 = vld [vmem:[%s663_s1 + $0x40] sm:$0xff]  }
   0xa   :  { %467 = vmatprep.subr.bf16.mxu1 %v497_v9  ;;  %v513_v25 = vld [vmem:[%s663_s1 + $0xc8] sm:$0xff]   ;;  %v517_v29 = vld [vmem:[%s663_s1 + $0xc0] sm:$0xff]  }
   0xb   :  { %v514_v26 = vld [vmem:[%s663_s1 + $0x8] sm:$0xff]   ;;  %v518_v30 = vld [vmem:[%s663_s1] sm:$0xff]  }
   0xc   :  { %446 = vmatpush3.bf16.msra.mxu0 %v498_v10  ;;  %v515_v27 = vld [vmem:[%s663_s1 + $0x88] sm:$0xff]   ;;  %v519_v31 = vld [vmem:[%s663_s1 + $0x80] sm:$0xff]  }
   0xd   :  { %468 = vmatpush3.bf16.msra.mxu1 %v499_v11  ;;  %447 = vmatprep.subr.bf16.mxu0 %v500_v12  ;;  %v18_v32 = vld [vmem:[%s664_s0] sm:$0xff]  ;;  %v19_v33 = vld [vmem:[%s664_s0 + $0x8] sm:$0xff] }
   0xe   :  { %469 = vmatprep.subr.bf16.mxu1 %v501_v13  ;;  %v405_v34 = vcombine.low %v18_v32, %v18_v32  ;;  %v406_v35 = vcombine.high %v18_v32, %v18_v32  ;;  %v407_v36 = vcombine.low %v19_v33, %v19_v33  ;;  %v408_v37 = vcombine.high %v19_v33, %v19_v33  ;;  %v380_v59 = vld [vmem:[%s665_s2] sm:$0xff] }
   0xf   :  { %v384_v62 = vld [vmem:[%s666_s3] sm:$0xff] }
  0x10   :  { %448 = vmatpush3.bf16.msra.mxu0 %v502_v14  ;;  %322 = vmatprep.mubr.bf16.mxu0 %v406_v35 }
  0x11   :  { %470 = vmatpush3.bf16.msra.mxu1 %v503_v15  ;;  %449 = vmatprep.subr.bf16.mxu0 %v504_v16 }
  0x12   :  { %471 = vmatprep.subr.bf16.mxu1 %v505_v17  ;;  %362 = vmatprep.mubr.bf16.mxu1 %v408_v37 }
  0x14   :  { %450 = vmatpush3.bf16.msra.mxu0 %v506_v18 }
  0x15   :  { %472 = vmatpush3.bf16.msra.mxu1 %v507_v19  ;;  %451 = vmatprep.subr.bf16.mxu0 %v508_v20 }
  0x16   :  { %473 = vmatprep.subr.bf16.mxu1 %v509_v21 }
  0x18   :  { %452 = vmatpush3.bf16.msra.mxu0 %v510_v22 }
  0x19   :  { %474 = vmatpush3.bf16.msra.mxu1 %v511_v23  ;;  %453 = vmatprep.subr.bf16.mxu0 %v512_v24 }
  0x1a   :  { %475 = vmatprep.subr.bf16.mxu1 %v513_v25 }
  0x1c   :  { %454 = vmatpush3.bf16.msra.mxu0 %v514_v26 }
  0x1d   :  { %476 = vmatpush3.bf16.msra.mxu1 %v515_v27  ;;  %455 = vmatprep.subr.bf16.mxu0 %v516_v28 }
  0x1e   :  { %477 = vmatprep.subr.bf16.mxu1 %v517_v29 }
  0x20   :  { %456 = vmatpush3.bf16.msra.mxu0 %v518_v30 }
  0x21   :  { %478 = vmatpush3.bf16.msra.mxu1 %v519_v31 }
  0x23   :  { %323 = vmatmul.mubr.bf16.vlgmr.msra.gmra.mxu0 %v405_v34 }
  0x24   :  { %363 = vmatmul.mubr.bf16.vlgmr.msra.gmra.mxu1 %v407_v36 }
  0xe3   :  { %v457_v38 = vpop.f32.mrf.mxu0 }
  0xe4   :  { %v479_v39 = vpop.f32.mrf.mxu1 }
  0xe5   :  { %v458_v40 = vpop.f32.mrf.mxu0 }
  0xe6   :  { %v480_v41 = vpop.f32.mrf.mxu1  ;;  %v459_v42 = vadd.f32 %v458_v40, %v457_v38 }
  0xe7   :  { %v481_v43 = vadd.f32 %v480_v41, %v479_v39  ;;  %v460_v44 = vpop.f32.mrf.mxu0 }
  0xe8   :  { %v482_v45 = vpop.f32.mrf.mxu1 }
  0xe9   :  { %v365_v46 = vadd.f32 %v481_v43, %v459_v42  ;;  %v461_v47 = vpop.f32.mrf.mxu0 }
  0xea   :  { %v483_v48 = vpop.f32.mrf.mxu1 }
  0xeb   :  { %370 = vadd.xlane.f32.xlu0 %v365_v46  ;;  %v373_v49 = vmul.f32 %v365_v46, %v365_v46 }
  0xef   :  { %374 = vadd.xlane.f32.xlu0 %v373_v49 }
 0x174   :  { %v371_v51 = vpop.xlane.xlu0 %370 }
 0x175   :  { %v372_v52 = vmul.f32 0.018518519, %v371_v51 }
 0x177   :  { %v377_v54 = vmul.f32 %v372_v52, %v372_v52 }
 0x178   :  { %v375_v53 = vpop.xlane.xlu0 %374 }
 0x179   :  { %v376_v55 = vmul.f32 0.018518519, %v375_v53 }
 0x17b   :  { %v378_v56 = vsub.f32 %v376_v55, %v377_v54 }
 0x17d   :  { %v379_v57 = vmax.f32 %v378_v56, 0.0 }
 0x17f   :  { %v381_v58 = vadd.f32 1e-05, %v379_v57 }
 0x181   :  { %524 = vrsqrt.f32 %v381_v58 }
 0x18e   :  { %v525_v60 = vpop.eup %524 }
 0x18f   :  { %v383_v61 = vmul.f32 %v525_v60, %v380_v59 }
 0x191   :  { %389 = vperm.xlu1 %486, %v383_v61   ;;  %v385_v63 = vmul.f32 %v383_v61, %v372_v52 }
 0x193   :  { %v386_v0 = vsub.f32 %v384_v62, %v385_v63 }
 0x195   :  { %395 = vperm.xlu1 %486, %v386_v0  }
 0x20c   :  { %v390_v1 = vpop.permute.xlu1 %389 }
 0x20d   :  { %v392_v2 = vmul.f32 %v390_v1, %v365_v46 }
 0x210   :  { %v396_v3 = vpop.permute.xlu1 %395 }
 0x211   :  { %v398_v4 = vadd.f32 %v396_v3, %v392_v2 }
 0x213   :  { %v399_v5 = vmax.f32 %v398_v4, 0.0 }
 0x215   :  { %400 = vst [vmem:[%s667_s4] sm:$0xff] %v399_v5 }

// kernel: generator_forward.8
= control target key start
LH: loop header
LB: loop body
LE: loop exit
PB: predicated region body
PF: predicated region fallthrough
CT: control target
= control target key end

     0   :  { %v1370_v36 = vmov 1983009808   ;;  %v151_v38 = vlaneseq  ;;  %vm972_vm0 = vcmask 1043456   ;;  %s1816_s1 = inlined_call_operand.vmem [shape: bf16[512,512], index: 1, kind: input, shape index: {}]   ;;  %s1817_s0 = inlined_call_operand.vmem [shape: bf16[4,512], index: 0, kind: input, shape index: {}]   ;;  %s1818_s2 = inlined_call_operand.vmem [shape: f32[4,1], index: 2, kind: input, shape index: {}]   ;;  %s1819_s3 = inlined_call_operand.vmem [shape: f32[4,1], index: 3, kind: input, shape index: {}]   ;;  %s1820_s4 = inlined_call_operand.vmem [shape: f32[4,512], index: 4, kind: output, shape index: {}]  }
   0x1   :  { %v1175_v0 = vld [vmem:[%s1816_s1 + $0xe4] ss:$16 sps:$4 sm:$0xff]   ;;  %v1179_v2 = vld [vmem:[%s1816_s1 + $0xe0] ss:$16 sps:$4 sm:$0xff]   ;;  %v149_v37 = vunpack.c.l.s4 %v1370_v36  ;;  %v1310_v36 = vld [vmem:[%s1816_s1 + $0x2c] ss:$16 sps:$4 sm:$0xff]  }
   0x2   :  { %v1177_v1 = vld [vmem:[%s1816_s1 + $0x2e4] ss:$16 sps:$4 sm:$0xff]   ;;  %808 = vmatprep.subr.bf16.mxu0 %v1175_v0  ;;  %v1180_v3 = vld [vmem:[%s1816_s1 + $0x2e0] ss:$16 sps:$4 sm:$0xff]   ;;  %v152_v43 = vshrl.u32 %v151_v38, 7 }
   0x3   :  { %849 = vmatprep.subr.bf16.mxu1 %v1177_v1  ;;  %v1181_v4 = vld [vmem:[%s1816_s1 + $0xc4] ss:$16 sps:$4 sm:$0xff]   ;;  %809 = vmatpush1.bf16.msra.mxu0 %v1179_v2  ;;  %v1185_v6 = vld [vmem:[%s1816_s1 + $0xc0] ss:$16 sps:$4 sm:$0xff]   ;;  %v150_v42 = vunpack.c.0.s8 %v149_v37  ;;  %v1313_v37 = vld [vmem:[%s1816_s1 + $0x22c] ss:$16 sps:$4 sm:$0xff]  }
   0x4   :  { %850 = vmatpush1.bf16.msra.mxu1 %v1180_v3  ;;  %v1183_v5 = vld [vmem:[%s1816_s1 + $0x2c4] ss:$16 sps:$4 sm:$0xff]   ;;  %810 = vmatprep.subr.bf16.mxu0 %v1181_v4  ;;  %v1186_v7 = vld [vmem:[%s1816_s1 + $0x2c0] ss:$16 sps:$4 sm:$0xff]   ;;  %v1308_v38 = vld [vmem:[%s1816_s1 + $0x28] ss:$16 sps:$4 sm:$0xff]  }
   0x5   :  { %851 = vmatprep.subr.bf16.mxu1 %v1183_v5  ;;  %v1187_v8 = vld [vmem:[%s1816_s1 + $0xa4] ss:$16 sps:$4 sm:$0xff]   ;;  %v1191_v10 = vld [vmem:[%s1816_s1 + $0xa0] ss:$16 sps:$4 sm:$0xff]   ;;  %v153_v49 = vsub.s32 %v150_v42, %v152_v43  ;;  %v1314_v42 = vld [vmem:[%s1816_s1 + $0x8] ss:$16 sps:$4 sm:$0xff]  }
   0x6   :  { %v1189_v9 = vld [vmem:[%s1816_s1 + $0x2a4] ss:$16 sps:$4 sm:$0xff]   ;;  %v1192_v11 = vld [vmem:[%s1816_s1 + $0x2a0] ss:$16 sps:$4 sm:$0xff]   ;;  %v1317_v43 = vld [vmem:[%s1816_s1 + $0x208] ss:$16 sps:$4 sm:$0xff]  }
   0x7   :  { %811 = vmatpush1.bf16.msra.mxu0 %v1185_v6  ;;  %v1193_v12 = vld [vmem:[%s1816_s1 + $0x84] ss:$16 sps:$4 sm:$0xff]   ;;  %v1197_v14 = vld [vmem:[%s1816_s1 + $0x80] ss:$16 sps:$4 sm:$0xff]  }
   0x8   :  { %852 = vmatpush1.bf16.msra.mxu1 %v1186_v7  ;;  %812 = vmatprep.subr.bf16.mxu0 %v1187_v8  ;;  %v1195_v13 = vld [vmem:[%s1816_s1 + $0x284] ss:$16 sps:$4 sm:$0xff]   ;;  %v1198_v15 = vld [vmem:[%s1816_s1 + $0x280] ss:$16 sps:$4 sm:$0xff]  }
   0x9   :  { %853 = vmatprep.subr.bf16.mxu1 %v1189_v9  ;;  %v1199_v16 = vld [vmem:[%s1816_s1 + $0x64] ss:$16 sps:$4 sm:$0xff]   ;;  %v1203_v18 = vld [vmem:[%s1816_s1 + $0x60] ss:$16 sps:$4 sm:$0xff]  }
   0xa   :  { %v1201_v17 = vld [vmem:[%s1816_s1 + $0x264] ss:$16 sps:$4 sm:$0xff]   ;;  %v1204_v19 = vld [vmem:[%s1816_s1 + $0x260] ss:$16 sps:$4 sm:$0xff]  }
   0xb   :  { %813 = vmatpush1.bf16.msra.mxu0 %v1191_v10  ;;  %v1205_v20 = vld [vmem:[%s1816_s1 + $0x44] ss:$16 sps:$4 sm:$0xff]   ;;  %v1209_v22 = vld [vmem:[%s1816_s1 + $0x40] ss:$16 sps:$4 sm:$0xff]  }
   0xc   :  { %854 = vmatpush1.bf16.msra.mxu1 %v1192_v11  ;;  %814 = vmatprep.subr.bf16.mxu0 %v1193_v12  ;;  %v1207_v21 = vld [vmem:[%s1816_s1 + $0x244] ss:$16 sps:$4 sm:$0xff]   ;;  %v1210_v23 = vld [vmem:[%s1816_s1 + $0x240] ss:$16 sps:$4 sm:$0xff]   ;;  %v1274_v12 = vld [vmem:[%s1816_s1 + $0xec] ss:$16 sps:$4 sm:$0xff]  }
   0xd   :  { %855 = vmatprep.subr.bf16.mxu1 %v1195_v13  ;;  %v1211_v24 = vld [vmem:[%s1816_s1 + $0x24] ss:$16 sps:$4 sm:$0xff]   ;;  %v1215_v26 = vld [vmem:[%s1816_s1 + $0x20] ss:$16 sps:$4 sm:$0xff]   ;;  %v1277_v13 = vld [vmem:[%s1816_s1 + $0x2ec] ss:$16 sps:$4 sm:$0xff]  }
   0xe   :  { %v1213_v25 = vld [vmem:[%s1816_s1 + $0x224] ss:$16 sps:$4 sm:$0xff]   ;;  %v1216_v27 = vld [vmem:[%s1816_s1 + $0x220] ss:$16 sps:$4 sm:$0xff]  }
   0xf   :  { %815 = vmatpush1.bf16.msra.mxu0 %v1197_v14  ;;  %v1217_v28 = vld [vmem:[%s1816_s1 + $0x4] ss:$16 sps:$4 sm:$0xff]   ;;  %v1221_v30 = vld [vmem:[%s1816_s1] ss:$16 sps:$4 sm:$0xff]   ;;  %v1272_v14 = vld [vmem:[%s1816_s1 + $0xe8] ss:$16 sps:$4 sm:$0xff]  }
  0x10   :  { %856 = vmatpush1.bf16.msra.mxu1 %v1198_v15  ;;  %816 = vmatprep.subr.bf16.mxu0 %v1199_v16  ;;  %v1219_v29 = vld [vmem:[%s1816_s1 + $0x204] ss:$16 sps:$4 sm:$0xff]   ;;  %v1222_v31 = vld [vmem:[%s1816_s1 + $0x200] ss:$16 sps:$4 sm:$0xff]   ;;  %v1275_v15 = vld [vmem:[%s1816_s1 + $0x2e8] ss:$16 sps:$4 sm:$0xff]  }
  0x11   :  { %857 = vmatprep.subr.bf16.mxu1 %v1201_v17  ;;  %v1223_v32 = vld [vmem:[%s1816_s1 + $0x1e4] ss:$16 sps:$4 sm:$0xff]   ;;  %v1227_v34 = vld [vmem:[%s1816_s1 + $0x1e0] ss:$16 sps:$4 sm:$0xff]   ;;  %v1280_v16 = vld [vmem:[%s1816_s1 + $0xcc] ss:$16 sps:$4 sm:$0xff]  }
  0x12   :  { %v1225_v33 = vld [vmem:[%s1816_s1 + $0x3e4] ss:$16 sps:$4 sm:$0xff]   ;;  %v1228_v35 = vld [vmem:[%s1816_s1 + $0x3e0] ss:$16 sps:$4 sm:$0xff]   ;;  %v1283_v17 = vld [vmem:[%s1816_s1 + $0x2cc] ss:$16 sps:$4 sm:$0xff]  }
  0x13   :  { %817 = vmatpush1.bf16.msra.mxu0 %v1203_v18  ;;  %v1229_v39 = vld [vmem:[%s1816_s1 + $0x1c4] ss:$16 sps:$4 sm:$0xff]   ;;  %v1233_v41 = vld [vmem:[%s1816_s1 + $0x1c0] ss:$16 sps:$4 sm:$0xff]   ;;  %v1278_v18 = vld [vmem:[%s1816_s1 + $0xc8] ss:$16 sps:$4 sm:$0xff]  }
  0x14   :  { %858 = vmatpush1.bf16.msra.mxu1 %v1204_v19  ;;  %818 = vmatprep.subr.bf16.mxu0 %v1205_v20  ;;  %v1231_v40 = vld [vmem:[%s1816_s1 + $0x3c4] ss:$16 sps:$4 sm:$0xff]   ;;  %v1234_v44 = vld [vmem:[%s1816_s1 + $0x3c0] ss:$16 sps:$4 sm:$0xff]   ;;  %v1281_v19 = vld [vmem:[%s1816_s1 + $0x2c8] ss:$16 sps:$4 sm:$0xff]  }
  0x15   :  { %859 = vmatprep.subr.bf16.mxu1 %v1207_v21  ;;  %v1235_v45 = vld [vmem:[%s1816_s1 + $0x1a4] ss:$16 sps:$4 sm:$0xff]   ;;  %v1239_v47 = vld [vmem:[%s1816_s1 + $0x1a0] ss:$16 sps:$4 sm:$0xff]   ;;  %v1286_v20 = vld [vmem:[%s1816_s1 + $0xac] ss:$16 sps:$4 sm:$0xff]  }
  0x16   :  { %v1237_v46 = vld [vmem:[%s1816_s1 + $0x3a4] ss:$16 sps:$4 sm:$0xff]   ;;  %v1240_v48 = vld [vmem:[%s1816_s1 + $0x3a0] ss:$16 sps:$4 sm:$0xff]   ;;  %v1289_v21 = vld [vmem:[%s1816_s1 + $0x2ac] ss:$16 sps:$4 sm:$0xff]  }
  0x17   :  { %819 = vmatpush1.bf16.msra.mxu0 %v1209_v22  ;;  %v1241_v50 = vld [vmem:[%s1816_s1 + $0x184] ss:$16 sps:$4 sm:$0xff]   ;;  %v1245_v53 = vld [vmem:[%s1816_s1 + $0x180] ss:$16 sps:$4 sm:$0xff]   ;;  %v1284_v22 = vld [vmem:[%s1816_s1 + $0xa8] ss:$16 sps:$4 sm:$0xff]  }
  0x18   :  { %860 = vmatpush1.bf16.msra.mxu1 %v1210_v23  ;;  %820 = vmatprep.subr.bf16.mxu0 %v1211_v24  ;;  %v1243_v51 = vld [vmem:[%s1816_s1 + $0x384] ss:$16 sps:$4 sm:$0xff]   ;;  %v1246_v56 = vld [vmem:[%s1816_s1 + $0x380] ss:$16 sps:$4 sm:$0xff]   ;;  %v1287_v23 = vld [vmem:[%s1816_s1 + $0x2a8] ss:$16 sps:$4 sm:$0xff]  }
  0x19   :  { %861 = vmatprep.subr.bf16.mxu1 %v1213_v25  ;;  %v17_v52 = vld [vmem:[%s1817_s0] sm:$0xff]  ;;  %v1292_v24 = vld [vmem:[%s1816_s1 + $0x8c] ss:$16 sps:$4 sm:$0xff]  }
  0x1a   :  { %v1541_v54 = vrot.slane %v17_v52, %v153_v49  ;;  %v147_v55 = vcombine.high %v17_v52, %v17_v52  ;;  %v1247_v57 = vld [vmem:[%s1816_s1 + $0x164] ss:$16 sps:$4 sm:$0xff]   ;;  %v1251_v61 = vld [vmem:[%s1816_s1 + $0x160] ss:$16 sps:$4 sm:$0xff]   ;;  %v1295_v25 = vld [vmem:[%s1816_s1 + $0x28c] ss:$16 sps:$4 sm:$0xff]  }
  0x1b   :  { %821 = vmatpush1.bf16.msra.mxu0 %v1215_v26  ;;  %v1249_v58 = vld [vmem:[%s1816_s1 + $0x364] ss:$16 sps:$4 sm:$0xff]   ;;  %v1252_v63 = vld [vmem:[%s1816_s1 + $0x360] ss:$16 sps:$4 sm:$0xff]   ;;  %v1290_v26 = vld [vmem:[%s1816_s1 + $0x88] ss:$16 sps:$4 sm:$0xff]  }
  0x1c   :  { %862 = vmatpush1.bf16.msra.mxu1 %v1216_v27  ;;  %822 = vmatprep.subr.bf16.mxu0 %v1217_v28  ;;  %v162_v59 = vcombine.high %v1541_v54, %v1541_v54  ;;  %v1554_v60 = vrot.slane %v147_v55, %v153_v49  ;;  %v1253_v0 = vld [vmem:[%s1816_s1 + $0x144] ss:$16 sps:$4 sm:$0xff]   ;;  %v1257_v2 = vld [vmem:[%s1816_s1 + $0x140] ss:$16 sps:$4 sm:$0xff]   ;;  %v1293_v27 = vld [vmem:[%s1816_s1 + $0x288] ss:$16 sps:$4 sm:$0xff]  }
  0x1d   :  { %863 = vmatprep.subr.bf16.mxu1 %v1219_v29  ;;  %v1255_v1 = vld [vmem:[%s1816_s1 + $0x344] ss:$16 sps:$4 sm:$0xff]   ;;  %v1258_v3 = vld [vmem:[%s1816_s1 + $0x340] ss:$16 sps:$4 sm:$0xff]   ;;  %v1298_v28 = vld [vmem:[%s1816_s1 + $0x6c] ss:$16 sps:$4 sm:$0xff]  }
  0x1e   :  { %840 = vmatprep.mubr.bf16.mxu0 %v162_v59  ;;  %v163_v62 = vcombine.high %v1554_v60, %v1554_v60  ;;  %v1259_v4 = vld [vmem:[%s1816_s1 + $0x124] ss:$16 sps:$4 sm:$0xff]   ;;  %v1263_v6 = vld [vmem:[%s1816_s1 + $0x120] ss:$16 sps:$4 sm:$0xff]   ;;  %v1301_v29 = vld [vmem:[%s1816_s1 + $0x26c] ss:$16 sps:$4 sm:$0xff]  }
  0x1f   :  { %823 = vmatpush1.bf16.msra.mxu0 %v1221_v30  ;;  %v1261_v5 = vld [vmem:[%s1816_s1 + $0x324] ss:$16 sps:$4 sm:$0xff]   ;;  %v1264_v7 = vld [vmem:[%s1816_s1 + $0x320] ss:$16 sps:$4 sm:$0xff]   ;;  %v1296_v30 = vld [vmem:[%s1816_s1 + $0x68] ss:$16 sps:$4 sm:$0xff]  }
  0x20   :  { %864 = vmatpush1.bf16.msra.mxu1 %v1222_v31  ;;  %824 = vmatprep.subr.bf16.mxu0 %v1223_v32  ;;  %v1265_v8 = vld [vmem:[%s1816_s1 + $0x104] ss:$16 sps:$4 sm:$0xff]   ;;  %v1269_v10 = vld [vmem:[%s1816_s1 + $0x100] ss:$16 sps:$4 sm:$0xff]   ;;  %v1299_v31 = vld [vmem:[%s1816_s1 + $0x268] ss:$16 sps:$4 sm:$0xff]  }
  0x21   :  { %865 = vmatprep.subr.bf16.mxu1 %v1225_v33  ;;  %881 = vmatprep.mubr.bf16.mxu1 %v163_v62  ;;  %v1267_v9 = vld [vmem:[%s1816_s1 + $0x304] ss:$16 sps:$4 sm:$0xff]   ;;  %v1270_v11 = vld [vmem:[%s1816_s1 + $0x300] ss:$16 sps:$4 sm:$0xff]   ;;  %v1304_v32 = vld [vmem:[%s1816_s1 + $0x4c] ss:$16 sps:$4 sm:$0xff]  }
  0x22   :  { %v1307_v33 = vld [vmem:[%s1816_s1 + $0x24c] ss:$16 sps:$4 sm:$0xff]   ;;  %v1332_v55 = vld [vmem:[%s1816_s1 + $0x1a8] ss:$16 sps:$4 sm:$0xff]  }
  0x23   :  { %825 = vmatpush2.bf16.msra.mxu0 %v1227_v34  ;;  %v1302_v34 = vld [vmem:[%s1816_s1 + $0x48] ss:$16 sps:$4 sm:$0xff]   ;;  %v1331_v49 = vld [vmem:[%s1816_s1 + $0x3cc] ss:$16 sps:$4 sm:$0xff]  }
  0x24   :  { %866 = vmatpush2.bf16.msra.mxu1 %v1228_v35  ;;  %826 = vmatprep.subr.bf16.mxu0 %v1229_v39  ;;  %v1305_v35 = vld [vmem:[%s1816_s1 + $0x248] ss:$16 sps:$4 sm:$0xff]   ;;  %v1334_v52 = vld [vmem:[%s1816_s1 + $0x1ac] ss:$16 sps:$4 sm:$0xff]  }
  0x25   :  { %867 = vmatprep.subr.bf16.mxu1 %v1231_v40  ;;  %v1311_v39 = vld [vmem:[%s1816_s1 + $0x228] ss:$16 sps:$4 sm:$0xff]   ;;  %v1316_v40 = vld [vmem:[%s1816_s1 + $0xc] ss:$16 sps:$4 sm:$0xff]  }
  0x27   :  { %827 = vmatpush2.bf16.msra.mxu0 %v1233_v41  ;;  %v1319_v41 = vld [vmem:[%s1816_s1 + $0x20c] ss:$16 sps:$4 sm:$0xff]  }
  0x28   :  { %868 = vmatpush2.bf16.msra.mxu1 %v1234_v44  ;;  %828 = vmatprep.subr.bf16.mxu0 %v1235_v45  ;;  %v1322_v44 = vld [vmem:[%s1816_s1 + $0x1ec] ss:$16 sps:$4 sm:$0xff]  }
  0x29   :  { %869 = vmatprep.subr.bf16.mxu1 %v1237_v46  ;;  %v1325_v45 = vld [vmem:[%s1816_s1 + $0x3ec] ss:$16 sps:$4 sm:$0xff]   ;;  %v1320_v46 = vld [vmem:[%s1816_s1 + $0x1e8] ss:$16 sps:$4 sm:$0xff]  }
  0x2b   :  { %829 = vmatpush2.bf16.msra.mxu0 %v1239_v47  ;;  %v1323_v47 = vld [vmem:[%s1816_s1 + $0x3e8] ss:$16 sps:$4 sm:$0xff]  }
  0x2c   :  { %870 = vmatpush2.bf16.msra.mxu1 %v1240_v48  ;;  %830 = vmatprep.subr.bf16.mxu0 %v1241_v50  ;;  %v1328_v48 = vld [vmem:[%s1816_s1 + $0x1cc] ss:$16 sps:$4 sm:$0xff]   ;;  %v1326_v50 = vld [vmem:[%s1816_s1 + $0x1c8] ss:$16 sps:$4 sm:$0xff]  }
  0x2d   :  { %871 = vmatprep.subr.bf16.mxu1 %v1243_v51  ;;  %v1329_v51 = vld [vmem:[%s1816_s1 + $0x3c8] ss:$16 sps:$4 sm:$0xff]  }
  0x2f   :  { %831 = vmatpush2.bf16.msra.mxu0 %v1245_v53  ;;  %v1337_v53 = vld [vmem:[%s1816_s1 + $0x3ac] ss:$16 sps:$4 sm:$0xff]  }
  0x30   :  { %872 = vmatpush2.bf16.msra.mxu1 %v1246_v56  ;;  %832 = vmatprep.subr.bf16.mxu0 %v1247_v57  ;;  %v1335_v56 = vld [vmem:[%s1816_s1 + $0x3a8] ss:$16 sps:$4 sm:$0xff]   ;;  %v1340_v57 = vld [vmem:[%s1816_s1 + $0x18c] ss:$16 sps:$4 sm:$0xff]  }
  0x31   :  { %873 = vmatprep.subr.bf16.mxu1 %v1249_v58  ;;  %v1343_v58 = vld [vmem:[%s1816_s1 + $0x38c] ss:$16 sps:$4 sm:$0xff]  }
  0x33   :  { %833 = vmatpush2.bf16.msra.mxu0 %v1251_v61  ;;  %v1341_v61 = vld [vmem:[%s1816_s1 + $0x388] ss:$16 sps:$4 sm:$0xff]  }
  0x34   :  { %874 = vmatpush2.bf16.msra.mxu1 %v1252_v63  ;;  %834 = vmatprep.subr.bf16.mxu0 %v1253_v0  ;;  %v1349_v63 = vld [vmem:[%s1816_s1 + $0x36c] ss:$16 sps:$4 sm:$0xff]   ;;  %v1344_v0 = vld [vmem:[%s1816_s1 + $0x168] ss:$16 sps:$4 sm:$0xff]  }
  0x35   :  { %875 = vmatprep.subr.bf16.mxu1 %v1255_v1  ;;  %v1347_v1 = vld [vmem:[%s1816_s1 + $0x368] ss:$16 sps:$4 sm:$0xff]  }
  0x37   :  { %835 = vmatpush2.bf16.msra.mxu0 %v1257_v2  ;;  %v1352_v2 = vld [vmem:[%s1816_s1 + $0x14c] ss:$16 sps:$4 sm:$0xff]  }
  0x38   :  { %876 = vmatpush2.bf16.msra.mxu1 %v1258_v3  ;;  %836 = vmatprep.subr.bf16.mxu0 %v1259_v4  ;;  %v1355_v3 = vld [vmem:[%s1816_s1 + $0x34c] ss:$16 sps:$4 sm:$0xff]   ;;  %v1350_v4 = vld [vmem:[%s1816_s1 + $0x148] ss:$16 sps:$4 sm:$0xff]  }
  0x39   :  { %877 = vmatprep.subr.bf16.mxu1 %v1261_v5  ;;  %v1353_v5 = vld [vmem:[%s1816_s1 + $0x348] ss:$16 sps:$4 sm:$0xff]  }
  0x3b   :  { %837 = vmatpush2.bf16.msra.mxu0 %v1263_v6  ;;  %v1358_v6 = vld [vmem:[%s1816_s1 + $0x12c] ss:$16 sps:$4 sm:$0xff]  }
  0x3c   :  { %878 = vmatpush2.bf16.msra.mxu1 %v1264_v7  ;;  %838 = vmatprep.subr.bf16.mxu0 %v1265_v8  ;;  %v1361_v7 = vld [vmem:[%s1816_s1 + $0x32c] ss:$16 sps:$4 sm:$0xff]   ;;  %v1356_v8 = vld [vmem:[%s1816_s1 + $0x128] ss:$16 sps:$4 sm:$0xff]  }
  0x3d   :  { %879 = vmatprep.subr.bf16.mxu1 %v1267_v9  ;;  %v1359_v9 = vld [vmem:[%s1816_s1 + $0x328] ss:$16 sps:$4 sm:$0xff]  }
  0x3f   :  { %839 = vmatpush2.bf16.msra.mxu0 %v1269_v10  ;;  %v1364_v10 = vld [vmem:[%s1816_s1 + $0x10c] ss:$16 sps:$4 sm:$0xff]  }
  0x40   :  { %880 = vmatpush2.bf16.msra.mxu1 %v1270_v11  ;;  %890 = vmatprep.subr.bf16.mxu0 %v1274_v12  ;;  %v1367_v11 = vld [vmem:[%s1816_s1 + $0x30c] ss:$16 sps:$4 sm:$0xff]   ;;  %v1362_v12 = vld [vmem:[%s1816_s1 + $0x108] ss:$16 sps:$4 sm:$0xff]  }
  0x41   :  { %931 = vmatprep.subr.bf16.mxu1 %v1277_v13  ;;  %v1365_v13 = vld [vmem:[%s1816_s1 + $0x308] ss:$16 sps:$4 sm:$0xff]  }
  0x42   :  { %841 = vmatmul.mubr.bf16.vlgmr.msra.gmra.mxu0 %v1541_v54 }
  0x43   :  { %882 = vmatmul.mubr.bf16.vlgmr.msra.gmra.mxu1 %v1554_v60  ;;  %891 = vmatpush1.bf16.msra.mxu0 %v1272_v14 }
  0x44   :  { %932 = vmatpush1.bf16.msra.mxu1 %v1275_v15  ;;  %892 = vmatprep.subr.bf16.mxu0 %v1280_v16 }
  0x45   :  { %933 = vmatprep.subr.bf16.mxu1 %v1283_v17  ;;  %922 = vmatprep.mubr.bf16.mxu0 %v162_v59  ;;  %v1338_v59 = vld [vmem:[%s1816_s1 + $0x188] ss:$16 sps:$4 sm:$0xff]  }
  0x46   :  { %963 = vmatprep.mubr.bf16.mxu1 %v163_v62  ;;  %v1346_v62 = vld [vmem:[%s1816_s1 + $0x16c] ss:$16 sps:$4 sm:$0xff]  }
  0x47   :  { %893 = vmatpush1.bf16.msra.mxu0 %v1278_v18 }
  0x48   :  { %934 = vmatpush1.bf16.msra.mxu1 %v1281_v19  ;;  %894 = vmatprep.subr.bf16.mxu0 %v1286_v20 }
  0x49   :  { %935 = vmatprep.subr.bf16.mxu1 %v1289_v21 }
  0x4b   :  { %895 = vmatpush1.bf16.msra.mxu0 %v1284_v22 }
  0x4c   :  { %936 = vmatpush1.bf16.msra.mxu1 %v1287_v23  ;;  %896 = vmatprep.subr.bf16.mxu0 %v1292_v24 }
  0x4d   :  { %937 = vmatprep.subr.bf16.mxu1 %v1295_v25 }
  0x4f   :  { %897 = vmatpush1.bf16.msra.mxu0 %v1290_v26 }
  0x50   :  { %938 = vmatpush1.bf16.msra.mxu1 %v1293_v27  ;;  %898 = vmatprep.subr.bf16.mxu0 %v1298_v28 }
  0x51   :  { %939 = vmatprep.subr.bf16.mxu1 %v1301_v29 }
  0x53   :  { %899 = vmatpush1.bf16.msra.mxu0 %v1296_v30 }
  0x54   :  { %940 = vmatpush1.bf16.msra.mxu1 %v1299_v31  ;;  %900 = vmatprep.subr.bf16.mxu0 %v1304_v32 }
  0x55   :  { %941 = vmatprep.subr.bf16.mxu1 %v1307_v33 }
  0x57   :  { %901 = vmatpush1.bf16.msra.mxu0 %v1302_v34 }
  0x58   :  { %942 = vmatpush1.bf16.msra.mxu1 %v1305_v35  ;;  %902 = vmatprep.subr.bf16.mxu0 %v1310_v36 }
  0x59   :  { %943 = vmatprep.subr.bf16.mxu1 %v1313_v37 }
  0x5b   :  { %903 = vmatpush1.bf16.msra.mxu0 %v1308_v38 }
  0x5c   :  { %944 = vmatpush1.bf16.msra.mxu1 %v1311_v39  ;;  %904 = vmatprep.subr.bf16.mxu0 %v1316_v40 }
  0x5d   :  { %945 = vmatprep.subr.bf16.mxu1 %v1319_v41 }
  0x5f   :  { %905 = vmatpush1.bf16.msra.mxu0 %v1314_v42 }
  0x60   :  { %946 = vmatpush1.bf16.msra.mxu1 %v1317_v43  ;;  %906 = vmatprep.subr.bf16.mxu0 %v1322_v44 }
  0x61   :  { %947 = vmatprep.subr.bf16.mxu1 %v1325_v45 }
  0x63   :  { %907 = vmatpush2.bf16.msra.mxu0 %v1320_v46 }
  0x64   :  { %948 = vmatpush2.bf16.msra.mxu1 %v1323_v47  ;;  %908 = vmatprep.subr.bf16.mxu0 %v1328_v48 }
  0x65   :  { %949 = vmatprep.subr.bf16.mxu1 %v1331_v49 }
  0x67   :  { %909 = vmatpush2.bf16.msra.mxu0 %v1326_v50  ;;  %v1371_v50 = vmov 0  }
  0x68   :  { %950 = vmatpush2.bf16.msra.mxu1 %v1329_v51  ;;  %910 = vmatprep.subr.bf16.mxu0 %v1334_v52 }
  0x69   :  { %951 = vmatprep.subr.bf16.mxu1 %v1337_v53  ;;  %1173 = vset.pattern.permute.xlu1 %v1371_v50 }
  0x6a   :  { %1174 = vset.pattern.permute.xlu0 %v1371_v50 }
  0x6b   :  { %911 = vmatpush2.bf16.msra.mxu0 %v1332_v55 }
  0x6c   :  { %952 = vmatpush2.bf16.msra.mxu1 %v1335_v56  ;;  %912 = vmatprep.subr.bf16.mxu0 %v1340_v57 }
  0x6d   :  { %953 = vmatprep.subr.bf16.mxu1 %v1343_v58 }
  0x6f   :  { %913 = vmatpush2.bf16.msra.mxu0 %v1338_v59 }
  0x70   :  { %954 = vmatpush2.bf16.msra.mxu1 %v1341_v61  ;;  %914 = vmatprep.subr.bf16.mxu0 %v1346_v62  ;;  %v1000_v61 = vld [vmem:[%s1818_s2] sm:$0xf] }
  0x71   :  { %955 = vmatprep.subr.bf16.mxu1 %v1349_v63 }
  0x73   :  { %915 = vmatpush2.bf16.msra.mxu0 %v1344_v0  ;;  %v1004_v0 = vld [vmem:[%s1819_s3] sm:$0xf] }
  0x74   :  { %956 = vmatpush2.bf16.msra.mxu1 %v1347_v1  ;;  %916 = vmatprep.subr.bf16.mxu0 %v1352_v2 }
  0x75   :  { %957 = vmatprep.subr.bf16.mxu1 %v1355_v3 }
  0x77   :  { %917 = vmatpush2.bf16.msra.mxu0 %v1350_v4 }
  0x78   :  { %958 = vmatpush2.bf16.msra.mxu1 %v1353_v5  ;;  %918 = vmatprep.subr.bf16.mxu0 %v1358_v6 }
  0x79   :  { %959 = vmatprep.subr.bf16.mxu1 %v1361_v7 }
  0x7b   :  { %919 = vmatpush2.bf16.msra.mxu0 %v1356_v8 }
  0x7c   :  { %960 = vmatpush2.bf16.msra.mxu1 %v1359_v9  ;;  %920 = vmatprep.subr.bf16.mxu0 %v1364_v10 }
  0x7d   :  { %961 = vmatprep.subr.bf16.mxu1 %v1367_v11 }
  0x7f   :  { %921 = vmatpush2.bf16.msra.mxu0 %v1362_v12 }
  0x80   :  { %962 = vmatpush2.bf16.msra.mxu1 %v1365_v13 }
  0x82   :  { %923 = vmatmul.mubr.bf16.vlgmr.msra.gmra.mxu0 %v1541_v54 }
  0x83   :  { %964 = vmatmul.mubr.bf16.vlgmr.msra.gmra.mxu1 %v1554_v60 }
 0x102   :  { %v842_v14 = vpop.f32.mrf.mxu0 }
 0x103   :  { %v883_v15 = vpop.f32.mrf.mxu1 }
 0x104   :  { %v844_v16 = vpop.f32.mrf.mxu0  ;;  %v884_v22 = vadd.f32 %v883_v15, %v842_v14 }
 0x105   :  { %v885_v17 = vpop.f32.mrf.mxu1 }
 0x106   :  { %v846_v18 = vpop.f32.mrf.mxu0  ;;  %v886_v23 = vadd.f32 %v885_v17, %v844_v16  ;;  %v983_v24 = vmul.f32 %v884_v22, %v884_v22  ;;  %v973_v26 = vsel %vm972_vm0, %v884_v22, 0.0 }
 0x107   :  { %v887_v19 = vpop.f32.mrf.mxu1 }
 0x108   :  { %v847_v20 = vpop.f32.mrf.mxu0  ;;  %v984_v25 = vmul.f32 %v886_v23, %v886_v23  ;;  %v974_v27 = vsel %vm972_vm0, %v886_v23, 0.0  ;;  %v987_v29 = vsel %vm972_vm0, %v983_v24, 0.0 }
 0x109   :  { %v888_v21 = vpop.f32.mrf.mxu1  ;;  %v975_v33 = vadd.f32 %v974_v27, %v973_v26 }
 0x10a   :  { %v988_v30 = vsel %vm972_vm0, %v984_v25, 0.0 }
 0x10b   :  { %v989_v40 = vadd.f32 %v988_v30, %v987_v29 }
 0x142   :  { %v924_v54 = vpop.f32.mrf.mxu0 }
 0x143   :  { %v965_v28 = vpop.f32.mrf.mxu1 }
 0x144   :  { %v966_v60 = vadd.f32 %v965_v28, %v924_v54  ;;  %v926_v31 = vpop.f32.mrf.mxu0 }
 0x145   :  { %v967_v32 = vpop.f32.mrf.mxu1 }
 0x146   :  { %v985_v34 = vmul.f32 %v966_v60, %v966_v60  ;;  %v968_v35 = vadd.f32 %v967_v32, %v926_v31  ;;  %v976_v36 = vsel %vm972_vm0, %v966_v60, 0.0  ;;  %v928_v37 = vpop.f32.mrf.mxu0 }
 0x147   :  { %v969_v38 = vpop.f32.mrf.mxu1  ;;  %v977_v39 = vadd.f32 %v976_v36, %v975_v33 }
 0x148   :  { %v978_v41 = vsel %vm972_vm0, %v968_v35, 0.0  ;;  %v986_v42 = vmul.f32 %v968_v35, %v968_v35  ;;  %v990_v43 = vsel %vm972_vm0, %v985_v34, 0.0  ;;  %v929_v44 = vpop.f32.mrf.mxu0 }
 0x149   :  { %v970_v45 = vpop.f32.mrf.mxu1  ;;  %v979_v46 = vadd.f32 %v978_v41, %v977_v39  ;;  %v991_v47 = vadd.f32 %v990_v43, %v989_v40 }
 0x14a   :  { %v992_v48 = vsel %vm972_vm0, %v986_v42, 0.0 }
 0x14b   :  { %980 = vadd.xlane.f32.xlu0 %v979_v46  ;;  %v993_v49 = vadd.f32 %v992_v48, %v991_v47 }
 0x14f   :  { %994 = vadd.xlane.f32.xlu0 %v993_v49 }
 0x1d4   :  { %v981_v51 = vpop.xlane.xlu0 %980 }
 0x1d5   :  { %v982_v52 = vmul.f32 0.0023148148, %v981_v51 }
 0x1d7   :  { %v997_v55 = vmul.f32 %v982_v52, %v982_v52 }
 0x1d8   :  { %v995_v53 = vpop.xlane.xlu0 %994 }
 0x1d9   :  { %v996_v56 = vmul.f32 0.0023148148, %v995_v53 }
 0x1db   :  { %v998_v57 = vsub.f32 %v996_v56, %v997_v55 }
 0x1dd   :  { %v999_v58 = vmax.f32 %v998_v57, 0.0 }
 0x1df   :  { %v1001_v59 = vadd.f32 1e-05, %v999_v58 }
 0x1e1   :  { %1368 = vrsqrt.f32 %v1001_v59 }
 0x1ee   :  { %v1369_v62 = vpop.eup %1368 }
 0x1ef   :  { %v1003_v63 = vmul.f32 %v1369_v62, %v1000_v61 }
 0x1f1   :  { %1009 = vperm.xlu1 %1173, %v1003_v63   ;;  %v1005_v1 = vmul.f32 %v1003_v63, %v982_v52 }
 0x1f3   :  { %v1006_v2 = vsub.f32 %v1004_v0, %v1005_v1 }
 0x1f5   :  { %1018 = vperm.xlu1 %1173, %v1006_v2  }
 0x26c   :  { %v1010_v3 = vpop.permute.xlu1 %1009 }
 0x26d   :  { %v1012_v4 = vmul.f32 %v1010_v3, %v884_v22  ;;  %v1013_v5 = vmul.f32 %v1010_v3, %v886_v23  ;;  %v1014_v6 = vmul.f32 %v1010_v3, %v966_v60  ;;  %v1015_v7 = vmul.f32 %v1010_v3, %v968_v35 }
 0x270   :  { %v1019_v8 = vpop.permute.xlu1 %1018 }
 0x271   :  { %v1021_v9 = vadd.f32 %v1019_v8, %v1012_v4  ;;  %v1022_v10 = vadd.f32 %v1019_v8, %v1013_v5  ;;  %v1023_v11 = vadd.f32 %v1019_v8, %v1014_v6  ;;  %v1024_v12 = vadd.f32 %v1019_v8, %v1015_v7 }
 0x273   :  { %v1025_v13 = vmax.f32 %v1021_v9, 0.0  ;;  %v1026_v14 = vmax.f32 %v1022_v10, 0.0  ;;  %v1027_v15 = vmax.f32 %v1023_v11, 0.0  ;;  %v1028_v16 = vmax.f32 %v1024_v12, 0.0 }
 0x275   :  { %v1033_v17 = vcombine.low %v1025_v13, %v1026_v14  ;;  %v1034_v18 = vcombine.low %v1027_v15, %v1028_v16 }
 0x277   :  { %1037 = vst [vmem:[%s1820_s4] sm:$0xff] %v1033_v17  ;;  %1038 = vst [vmem:[%s1820_s4 + $0x8] sm:$0xff] %v1034_v18 }

// kernel: generator_forward.9
= control target key start
LH: loop header
LB: loop body
LE: loop exit
PB: predicated region body
PF: predicated region fallthrough
CT: control target
= control target key end

     0   :  { %v2361_v35 = vmov 1966171168   ;;  %v280_v37 = vlaneseq  ;;  %s3195_s1 = inlined_call_operand.vmem [shape: bf16[256,2048], index: 1, kind: input, shape index: {}]   ;;  %s3196_s0 = inlined_call_operand.vmem [shape: bf16[1,256], index: 0, kind: input, shape index: {}]   ;;  %s3197_s2 = inlined_call_operand.vmem [shape: f32[1,2048], index: 2, kind: output, shape index: {}]  }
   0x1   :  { %v124_v0 = vld [vmem:[%s3195_s1 + $0x380] sm:$0xff]  ;;  %v125_v2 = vld [vmem:[%s3195_s1 + $0x388] sm:$0xff]  ;;  %v278_v36 = vunpack.c.l.s4 %v2361_v35 }
   0x2   :  { %v132_v1 = vld [vmem:[%s3195_s1 + $0x3c0] sm:$0xff]  ;;  %v133_v4 = vld [vmem:[%s3195_s1 + $0x3c8] sm:$0xff]  ;;  %v281_v47 = vshrl.u32 %v280_v37, 7 }
   0x3   :  { %v2185_v3 = vcombine.high %v124_v0, %v132_v1  ;;  %v2184_v5 = vcombine.low %v124_v0, %v132_v1  ;;  %v108_v6 = vld [vmem:[%s3195_s1 + $0x300] sm:$0xff]  ;;  %v2187_v8 = vcombine.high %v125_v2, %v133_v4  ;;  %v2186_v9 = vcombine.low %v125_v2, %v133_v4  ;;  %v109_v11 = vld [vmem:[%s3195_s1 + $0x308] sm:$0xff] }
   0x4   :  { %v116_v7 = vld [vmem:[%s3195_s1 + $0x340] sm:$0xff]  ;;  %v117_v12 = vld [vmem:[%s3195_s1 + $0x348] sm:$0xff]  ;;  %v279_v46 = vunpack.c.0.s8 %v278_v36 }
   0x5   :  { %v2169_v10 = vcombine.high %v108_v6, %v116_v7  ;;  %v92_v13 = vld [vmem:[%s3195_s1 + $0x280] sm:$0xff]  ;;  %1573 = vmatprep.subr.bf16.mxu0 %v2185_v3  ;;  %v2171_v14 = vcombine.high %v109_v11, %v117_v12  ;;  %v93_v16 = vld [vmem:[%s3195_s1 + $0x288] sm:$0xff]  ;;  %1614 = vmatprep.subr.bf16.mxu1 %v2187_v8  ;;  %v2168_v18 = vcombine.low %v108_v6, %v116_v7 }
   0x6   :  { %v100_v15 = vld [vmem:[%s3195_s1 + $0x2c0] sm:$0xff]  ;;  %v101_v17 = vld [vmem:[%s3195_s1 + $0x2c8] sm:$0xff]  ;;  %1574 = vmatpush1.bf16.msra.mxu0 %v2184_v5  ;;  %1615 = vmatpush1.bf16.msra.mxu1 %v2186_v9  ;;  %v2170_v19 = vcombine.low %v109_v11, %v117_v12  ;;  %v2461_v56 = vsub.s32 %v279_v46, %v281_v47 }
   0x7   :  { %1575 = vmatprep.subr.bf16.mxu0 %v2169_v10  ;;  %v2153_v20 = vcombine.high %v92_v13, %v100_v15  ;;  %1616 = vmatprep.subr.bf16.mxu1 %v2171_v14  ;;  %v2155_v21 = vcombine.high %v93_v16, %v101_v17  ;;  %v76_v22 = vld [vmem:[%s3195_s1 + $0x200] sm:$0xff]  ;;  %v77_v24 = vld [vmem:[%s3195_s1 + $0x208] sm:$0xff]  ;;  %v2152_v26 = vcombine.low %v92_v13, %v100_v15 }
   0x8   :  { %v84_v23 = vld [vmem:[%s3195_s1 + $0x240] sm:$0xff]  ;;  %v85_v25 = vld [vmem:[%s3195_s1 + $0x248] sm:$0xff]  ;;  %v2154_v27 = vcombine.low %v93_v16, %v101_v17 }
   0x9   :  { %v2137_v28 = vcombine.high %v76_v22, %v84_v23  ;;  %v2139_v29 = vcombine.high %v77_v24, %v85_v25  ;;  %v60_v30 = vld [vmem:[%s3195_s1 + $0x180] sm:$0xff]  ;;  %v61_v32 = vld [vmem:[%s3195_s1 + $0x188] sm:$0xff]  ;;  %v2136_v34 = vcombine.low %v76_v22, %v84_v23  ;;  %v2138_v38 = vcombine.low %v77_v24, %v85_v25 }
   0xa   :  { %1576 = vmatpush1.bf16.msra.mxu0 %v2168_v18  ;;  %1617 = vmatpush1.bf16.msra.mxu1 %v2170_v19  ;;  %v68_v31 = vld [vmem:[%s3195_s1 + $0x1c0] sm:$0xff]  ;;  %v69_v33 = vld [vmem:[%s3195_s1 + $0x1c8] sm:$0xff] }
   0xb   :  { %1577 = vmatprep.subr.bf16.mxu0 %v2153_v20  ;;  %1618 = vmatprep.subr.bf16.mxu1 %v2155_v21  ;;  %v2121_v39 = vcombine.high %v60_v30, %v68_v31  ;;  %v2123_v40 = vcombine.high %v61_v32, %v69_v33  ;;  %v44_v41 = vld [vmem:[%s3195_s1 + $0x100] sm:$0xff]  ;;  %v45_v43 = vld [vmem:[%s3195_s1 + $0x108] sm:$0xff]  ;;  %v2120_v45 = vcombine.low %v60_v30, %v68_v31 }
   0xc   :  { %v52_v42 = vld [vmem:[%s3195_s1 + $0x140] sm:$0xff]  ;;  %v53_v44 = vld [vmem:[%s3195_s1 + $0x148] sm:$0xff]  ;;  %v2122_v48 = vcombine.low %v61_v32, %v69_v33 }
   0xd   :  { %v2105_v49 = vcombine.high %v44_v41, %v52_v42  ;;  %v2107_v50 = vcombine.high %v45_v43, %v53_v44  ;;  %v28_v51 = vld [vmem:[%s3195_s1 + $0x80] sm:$0xff]  ;;  %v29_v53 = vld [vmem:[%s3195_s1 + $0x88] sm:$0xff]  ;;  %v2104_v55 = vcombine.low %v44_v41, %v52_v42  ;;  %v2106_v57 = vcombine.low %v45_v43, %v53_v44 }
   0xe   :  { %1578 = vmatpush1.bf16.msra.mxu0 %v2152_v26  ;;  %1619 = vmatpush1.bf16.msra.mxu1 %v2154_v27  ;;  %v36_v52 = vld [vmem:[%s3195_s1 + $0xc0] sm:$0xff]  ;;  %v37_v54 = vld [vmem:[%s3195_s1 + $0xc8] sm:$0xff] }
   0xf   :  { %1579 = vmatprep.subr.bf16.mxu0 %v2137_v28  ;;  %1620 = vmatprep.subr.bf16.mxu1 %v2139_v29  ;;  %v2089_v58 = vcombine.high %v28_v51, %v36_v52  ;;  %v2466_v59 = vld.sshfl [vmem:[%s3196_s0] sm:$0x11 pattern:$0x75316420]  ;;  %v2091_v60 = vcombine.high %v29_v53, %v37_v54  ;;  %v13_v0 = vld [vmem:[%s3195_s1 + $0x8] sm:$0xff]  ;;  %v2088_v2 = vcombine.low %v28_v51, %v36_v52 }
  0x10   :  { %v12_v61 = vld [vmem:[%s3195_s1] sm:$0xff]  ;;  %v276_v63 = vcombine.high %v2466_v59, %v2466_v59  ;;  %v21_v1 = vld [vmem:[%s3195_s1 + $0x48] sm:$0xff]  ;;  %v2090_v4 = vcombine.low %v29_v53, %v37_v54 }
  0x11   :  { %v20_v62 = vld [vmem:[%s3195_s1 + $0x40] sm:$0xff]  ;;  %v2075_v6 = vcombine.high %v13_v0, %v21_v1  ;;  %v253_v9 = vld [vmem:[%s3195_s1 + $0x788] sm:$0xff]  ;;  %v2074_v12 = vcombine.low %v13_v0, %v21_v1 }
  0x12   :  { %1580 = vmatpush1.bf16.msra.mxu0 %v2136_v34  ;;  %1621 = vmatpush1.bf16.msra.mxu1 %v2138_v38  ;;  %v2483_v3 = vrot.slane %v276_v63, %v2461_v56  ;;  %v2073_v5 = vcombine.high %v12_v61, %v20_v62  ;;  %v252_v7 = vld [vmem:[%s3195_s1 + $0x780] sm:$0xff]  ;;  %v261_v10 = vld [vmem:[%s3195_s1 + $0x7c8] sm:$0xff]  ;;  %v2072_v11 = vcombine.low %v12_v61, %v20_v62 }
  0x13   :  { %1581 = vmatprep.subr.bf16.mxu0 %v2121_v39  ;;  %1622 = vmatprep.subr.bf16.mxu1 %v2123_v40  ;;  %v260_v8 = vld [vmem:[%s3195_s1 + $0x7c0] sm:$0xff]  ;;  %v2315_v14 = vcombine.high %v253_v9, %v261_v10  ;;  %v237_v17 = vld [vmem:[%s3195_s1 + $0x708] sm:$0xff]  ;;  %v2314_v20 = vcombine.low %v253_v9, %v261_v10  ;;  %v126_v10 = vld [vmem:[%s3195_s1 + $0x390] sm:$0xff] }
  0x14   :  { %1605 = vmatprep.mubr.bf16.mxu0 %v2483_v3  ;;  %1646 = vmatprep.mubr.bf16.mxu1 %v2483_v3  ;;  %v2313_v13 = vcombine.high %v252_v7, %v260_v8  ;;  %v236_v15 = vld [vmem:[%s3195_s1 + $0x700] sm:$0xff]  ;;  %v245_v18 = vld [vmem:[%s3195_s1 + $0x748] sm:$0xff]  ;;  %v2312_v19 = vcombine.low %v252_v7, %v260_v8 }
  0x15   :  { %v244_v16 = vld [vmem:[%s3195_s1 + $0x740] sm:$0xff]  ;;  %v2299_v22 = vcombine.high %v237_v17, %v245_v18  ;;  %v221_v25 = vld [vmem:[%s3195_s1 + $0x688] sm:$0xff]  ;;  %v2298_v28 = vcombine.low %v237_v17, %v245_v18  ;;  %v110_v18 = vld [vmem:[%s3195_s1 + $0x310] sm:$0xff] }
  0x16   :  { %1582 = vmatpush1.bf16.msra.mxu0 %v2120_v45  ;;  %1623 = vmatpush1.bf16.msra.mxu1 %v2122_v48  ;;  %v2297_v21 = vcombine.high %v236_v15, %v244_v16  ;;  %v220_v23 = vld [vmem:[%s3195_s1 + $0x680] sm:$0xff]  ;;  %v229_v26 = vld [vmem:[%s3195_s1 + $0x6c8] sm:$0xff]  ;;  %v2296_v27 = vcombine.low %v236_v15, %v244_v16 }
  0x17   :  { %1583 = vmatprep.subr.bf16.mxu0 %v2105_v49  ;;  %1624 = vmatprep.subr.bf16.mxu1 %v2107_v50  ;;  %v228_v24 = vld [vmem:[%s3195_s1 + $0x6c0] sm:$0xff]  ;;  %v2283_v30 = vcombine.high %v221_v25, %v229_v26  ;;  %v205_v33 = vld [vmem:[%s3195_s1 + $0x608] sm:$0xff]  ;;  %v2282_v36 = vcombine.low %v221_v25, %v229_v26 }
  0x18   :  { %v2281_v29 = vcombine.high %v220_v23, %v228_v24  ;;  %v204_v31 = vld [vmem:[%s3195_s1 + $0x600] sm:$0xff]  ;;  %v213_v34 = vld [vmem:[%s3195_s1 + $0x648] sm:$0xff]  ;;  %v2280_v35 = vcombine.low %v220_v23, %v228_v24 }
  0x19   :  { %v212_v32 = vld [vmem:[%s3195_s1 + $0x640] sm:$0xff]  ;;  %v2267_v38 = vcombine.high %v205_v33, %v213_v34  ;;  %v189_v41 = vld [vmem:[%s3195_s1 + $0x588] sm:$0xff]  ;;  %v2266_v44 = vcombine.low %v205_v33, %v213_v34  ;;  %v78_v34 = vld [vmem:[%s3195_s1 + $0x210] sm:$0xff] }
  0x1a   :  { %1584 = vmatpush1.bf16.msra.mxu0 %v2104_v55  ;;  %1625 = vmatpush1.bf16.msra.mxu1 %v2106_v57  ;;  %v2265_v37 = vcombine.high %v204_v31, %v212_v32  ;;  %v188_v39 = vld [vmem:[%s3195_s1 + $0x580] sm:$0xff]  ;;  %v197_v42 = vld [vmem:[%s3195_s1 + $0x5c8] sm:$0xff]  ;;  %v2264_v43 = vcombine.low %v204_v31, %v212_v32 }
  0x1b   :  { %1585 = vmatprep.subr.bf16.mxu0 %v2089_v58  ;;  %1626 = vmatprep.subr.bf16.mxu1 %v2091_v60  ;;  %v196_v40 = vld [vmem:[%s3195_s1 + $0x5c0] sm:$0xff]  ;;  %v2251_v46 = vcombine.high %v189_v41, %v197_v42  ;;  %v173_v49 = vld [vmem:[%s3195_s1 + $0x508] sm:$0xff]  ;;  %v2250_v52 = vcombine.low %v189_v41, %v197_v42  ;;  %v62_v42 = vld [vmem:[%s3195_s1 + $0x190] sm:$0xff] }
  0x1c   :  { %v2249_v45 = vcombine.high %v188_v39, %v196_v40  ;;  %v172_v47 = vld [vmem:[%s3195_s1 + $0x500] sm:$0xff]  ;;  %v181_v50 = vld [vmem:[%s3195_s1 + $0x548] sm:$0xff]  ;;  %v2248_v51 = vcombine.low %v188_v39, %v196_v40 }
  0x1d   :  { %v180_v48 = vld [vmem:[%s3195_s1 + $0x540] sm:$0xff]  ;;  %v2235_v54 = vcombine.high %v173_v49, %v181_v50  ;;  %v157_v58 = vld [vmem:[%s3195_s1 + $0x488] sm:$0xff]  ;;  %v2234_v62 = vcombine.low %v173_v49, %v181_v50  ;;  %v46_v50 = vld [vmem:[%s3195_s1 + $0x110] sm:$0xff] }
  0x1e   :  { %1586 = vmatpush1.bf16.msra.mxu0 %v2088_v2  ;;  %1627 = vmatpush1.bf16.msra.mxu1 %v2090_v4  ;;  %v2233_v53 = vcombine.high %v172_v47, %v180_v48  ;;  %v156_v55 = vld [vmem:[%s3195_s1 + $0x480] sm:$0xff]  ;;  %v165_v60 = vld [vmem:[%s3195_s1 + $0x4c8] sm:$0xff]  ;;  %v2232_v61 = vcombine.low %v172_v47, %v180_v48 }
  0x1f   :  { %1587 = vmatprep.subr.bf16.mxu0 %v2073_v5  ;;  %1628 = vmatprep.subr.bf16.mxu1 %v2075_v6  ;;  %v164_v57 = vld [vmem:[%s3195_s1 + $0x4c0] sm:$0xff]  ;;  %v2219_v0 = vcombine.high %v157_v58, %v165_v60  ;;  %v141_v4 = vld [vmem:[%s3195_s1 + $0x408] sm:$0xff]  ;;  %v2218_v7 = vcombine.low %v157_v58, %v165_v60  ;;  %v30_v60 = vld [vmem:[%s3195_s1 + $0x90] sm:$0xff] }
  0x20   :  { %v2217_v63 = vcombine.high %v156_v55, %v164_v57  ;;  %v140_v1 = vld [vmem:[%s3195_s1 + $0x400] sm:$0xff]  ;;  %v149_v5 = vld [vmem:[%s3195_s1 + $0x448] sm:$0xff]  ;;  %v2216_v6 = vcombine.low %v156_v55, %v164_v57 }
  0x21   :  { %v148_v2 = vld [vmem:[%s3195_s1 + $0x440] sm:$0xff]  ;;  %v2203_v9 = vcombine.high %v141_v4, %v149_v5  ;;  %v2202_v15 = vcombine.low %v141_v4, %v149_v5  ;;  %v14_v5 = vld [vmem:[%s3195_s1 + $0x10] sm:$0xff] }
  0x22   :  { %1588 = vmatpush1.bf16.msra.mxu0 %v2072_v11  ;;  %1629 = vmatpush1.bf16.msra.mxu1 %v2074_v12  ;;  %v2201_v8 = vcombine.high %v140_v1, %v148_v2  ;;  %v134_v11 = vld [vmem:[%s3195_s1 + $0x3d0] sm:$0xff]  ;;  %v127_v12 = vld [vmem:[%s3195_s1 + $0x398] sm:$0xff] }
  0x23   :  { %1589 = vmatprep.subr.bf16.mxu0 %v2313_v13  ;;  %1630 = vmatprep.subr.bf16.mxu1 %v2315_v14  ;;  %v135_v13 = vld [vmem:[%s3195_s1 + $0x3d8] sm:$0xff]  ;;  %v2200_v14 = vcombine.low %v140_v1, %v148_v2  ;;  %v2189_v16 = vcombine.high %v126_v10, %v134_v11  ;;  %v2188_v23 = vcombine.low %v126_v10, %v134_v11 }
  0x24   :  { %v2191_v17 = vcombine.high %v127_v12, %v135_v13  ;;  %v2190_v24 = vcombine.low %v127_v12, %v135_v13  ;;  %v254_v13 = vld [vmem:[%s3195_s1 + $0x790] sm:$0xff] }
  0x26   :  { %1590 = vmatpush2.bf16.msra.mxu0 %v2312_v19  ;;  %1631 = vmatpush2.bf16.msra.mxu1 %v2314_v20  ;;  %v118_v19 = vld [vmem:[%s3195_s1 + $0x350] sm:$0xff]  ;;  %v2603_v20 = vrot.slane %v2466_v59, %v2461_v56 }
  0x27   :  { %1591 = vmatprep.subr.bf16.mxu0 %v2297_v21  ;;  %1632 = vmatprep.subr.bf16.mxu1 %v2299_v22  ;;  %v111_v21 = vld [vmem:[%s3195_s1 + $0x318] sm:$0xff]  ;;  %v2173_v25 = vcombine.high %v110_v18, %v118_v19  ;;  %v94_v59 = vld [vmem:[%s3195_s1 + $0x290] sm:$0xff] }
  0x28   :  { %v119_v22 = vld [vmem:[%s3195_s1 + $0x358] sm:$0xff] }
  0x29   :  { %v2175_v26 = vcombine.high %v111_v21, %v119_v22  ;;  %v2174_v31 = vcombine.low %v111_v21, %v119_v22  ;;  %v238_v22 = vld [vmem:[%s3195_s1 + $0x710] sm:$0xff] }
  0x2a   :  { %1592 = vmatpush2.bf16.msra.mxu0 %v2296_v27  ;;  %1633 = vmatpush2.bf16.msra.mxu1 %v2298_v28  ;;  %v102_v27 = vld [vmem:[%s3195_s1 + $0x2d0] sm:$0xff]  ;;  %v95_v28 = vld [vmem:[%s3195_s1 + $0x298] sm:$0xff] }
  0x2b   :  { %1593 = vmatprep.subr.bf16.mxu0 %v2281_v29  ;;  %1634 = vmatprep.subr.bf16.mxu1 %v2283_v30  ;;  %v103_v29 = vld [vmem:[%s3195_s1 + $0x2d8] sm:$0xff]  ;;  %v2172_v30 = vcombine.low %v110_v18, %v118_v19  ;;  %v2157_v32 = vcombine.high %v94_v59, %v102_v27 }
  0x2c   :  { %v2159_v33 = vcombine.high %v95_v28, %v103_v29  ;;  %v2158_v39 = vcombine.low %v95_v28, %v103_v29  ;;  %v222_v29 = vld [vmem:[%s3195_s1 + $0x690] sm:$0xff] }
  0x2e   :  { %1594 = vmatpush2.bf16.msra.mxu0 %v2280_v35  ;;  %1635 = vmatpush2.bf16.msra.mxu1 %v2282_v36  ;;  %v86_v35 = vld [vmem:[%s3195_s1 + $0x250] sm:$0xff]  ;;  %v79_v36 = vld [vmem:[%s3195_s1 + $0x218] sm:$0xff] }
  0x2f   :  { %1595 = vmatprep.subr.bf16.mxu0 %v2265_v37  ;;  %1636 = vmatprep.subr.bf16.mxu1 %v2267_v38  ;;  %v87_v37 = vld [vmem:[%s3195_s1 + $0x258] sm:$0xff]  ;;  %v2156_v38 = vcombine.low %v94_v59, %v102_v27  ;;  %v2141_v40 = vcombine.high %v78_v34, %v86_v35 }
  0x30   :  { %v2143_v41 = vcombine.high %v79_v36, %v87_v37  ;;  %v2142_v47 = vcombine.low %v79_v36, %v87_v37  ;;  %v206_v37 = vld [vmem:[%s3195_s1 + $0x610] sm:$0xff] }
  0x32   :  { %1596 = vmatpush2.bf16.msra.mxu0 %v2264_v43  ;;  %1637 = vmatpush2.bf16.msra.mxu1 %v2266_v44  ;;  %v70_v43 = vld [vmem:[%s3195_s1 + $0x1d0] sm:$0xff]  ;;  %v63_v44 = vld [vmem:[%s3195_s1 + $0x198] sm:$0xff] }
  0x33   :  { %1597 = vmatprep.subr.bf16.mxu0 %v2249_v45  ;;  %1638 = vmatprep.subr.bf16.mxu1 %v2251_v46  ;;  %v71_v45 = vld [vmem:[%s3195_s1 + $0x1d8] sm:$0xff]  ;;  %v2140_v46 = vcombine.low %v78_v34, %v86_v35  ;;  %v2125_v48 = vcombine.high %v62_v42, %v70_v43 }
  0x34   :  { %v2127_v49 = vcombine.high %v63_v44, %v71_v45  ;;  %v2126_v55 = vcombine.low %v63_v44, %v71_v45  ;;  %v190_v45 = vld [vmem:[%s3195_s1 + $0x590] sm:$0xff] }
  0x36   :  { %1598 = vmatpush2.bf16.msra.mxu0 %v2248_v51  ;;  %1639 = vmatpush2.bf16.msra.mxu1 %v2250_v52  ;;  %v54_v51 = vld [vmem:[%s3195_s1 + $0x150] sm:$0xff]  ;;  %v47_v52 = vld [vmem:[%s3195_s1 + $0x118] sm:$0xff] }
  0x37   :  { %1599 = vmatprep.subr.bf16.mxu0 %v2233_v53  ;;  %1640 = vmatprep.subr.bf16.mxu1 %v2235_v54  ;;  %v55_v53 = vld [vmem:[%s3195_s1 + $0x158] sm:$0xff]  ;;  %v2124_v54 = vcombine.low %v62_v42, %v70_v43  ;;  %v2109_v57 = vcombine.high %v46_v50, %v54_v51 }
  0x38   :  { %v2111_v58 = vcombine.high %v47_v52, %v55_v53  ;;  %v2110_v1 = vcombine.low %v47_v52, %v55_v53  ;;  %v174_v53 = vld [vmem:[%s3195_s1 + $0x510] sm:$0xff] }
  0x3a   :  { %1600 = vmatpush2.bf16.msra.mxu0 %v2232_v61  ;;  %1641 = vmatpush2.bf16.msra.mxu1 %v2234_v62  ;;  %v38_v61 = vld [vmem:[%s3195_s1 + $0xd0] sm:$0xff]  ;;  %v31_v62 = vld [vmem:[%s3195_s1 + $0x98] sm:$0xff] }
  0x3b   :  { %1601 = vmatprep.subr.bf16.mxu0 %v2217_v63  ;;  %1642 = vmatprep.subr.bf16.mxu1 %v2219_v0  ;;  %v39_v63 = vld [vmem:[%s3195_s1 + $0xd8] sm:$0xff]  ;;  %v2108_v0 = vcombine.low %v46_v50, %v54_v51  ;;  %v2093_v2 = vcombine.high %v30_v60, %v38_v61 }
  0x3c   :  { %v2095_v4 = vcombine.high %v31_v62, %v39_v63  ;;  %v2094_v10 = vcombine.low %v31_v62, %v39_v63  ;;  %v158_v63 = vld [vmem:[%s3195_s1 + $0x490] sm:$0xff] }
  0x3e   :  { %1602 = vmatpush2.bf16.msra.mxu0 %v2216_v6  ;;  %1643 = vmatpush2.bf16.msra.mxu1 %v2218_v7  ;;  %v22_v6 = vld [vmem:[%s3195_s1 + $0x50] sm:$0xff]  ;;  %v15_v7 = vld [vmem:[%s3195_s1 + $0x18] sm:$0xff] }
  0x3f   :  { %1603 = vmatprep.subr.bf16.mxu0 %v2201_v8  ;;  %1644 = vmatprep.subr.bf16.mxu1 %v2203_v9  ;;  %v23_v8 = vld [vmem:[%s3195_s1 + $0x58] sm:$0xff]  ;;  %v2092_v9 = vcombine.low %v30_v60, %v38_v61  ;;  %v2077_v11 = vcombine.high %v14_v5, %v22_v6 }
  0x40   :  { %v2079_v12 = vcombine.high %v15_v7, %v23_v8  ;;  %v2078_v18 = vcombine.low %v15_v7, %v23_v8  ;;  %v142_v8 = vld [vmem:[%s3195_s1 + $0x410] sm:$0xff] }
  0x42   :  { %1604 = vmatpush2.bf16.msra.mxu0 %v2200_v14  ;;  %1645 = vmatpush2.bf16.msra.mxu1 %v2202_v15  ;;  %v262_v14 = vld [vmem:[%s3195_s1 + $0x7d0] sm:$0xff]  ;;  %v255_v15 = vld [vmem:[%s3195_s1 + $0x798] sm:$0xff] }
  0x43   :  { %1655 = vmatprep.subr.bf16.mxu0 %v2189_v16  ;;  %1696 = vmatprep.subr.bf16.mxu1 %v2191_v17  ;;  %v263_v16 = vld [vmem:[%s3195_s1 + $0x7d8] sm:$0xff]  ;;  %v2076_v17 = vcombine.low %v14_v5, %v22_v6  ;;  %v2317_v19 = vcombine.high %v254_v13, %v262_v14 }
  0x44   :  { %v2319_v21 = vcombine.high %v255_v15, %v263_v16  ;;  %v2318_v59 = vcombine.low %v255_v15, %v263_v16  ;;  %v128_v16 = vld [vmem:[%s3195_s1 + $0x3a0] sm:$0xff] }
  0x45   :  { %1606 = vmatmul.mubr.bf16.vlgmr.msra.gmra.mxu0 %v2603_v20  ;;  %1647 = vmatmul.mubr.bf16.vlgmr.msra.gmra.mxu1 %v2603_v20 }
  0x46   :  { %1656 = vmatpush1.bf16.msra.mxu0 %v2188_v23  ;;  %1697 = vmatpush1.bf16.msra.mxu1 %v2190_v24  ;;  %v246_v23 = vld [vmem:[%s3195_s1 + $0x750] sm:$0xff]  ;;  %v239_v24 = vld [vmem:[%s3195_s1 + $0x718] sm:$0xff] }
  0x47   :  { %1657 = vmatprep.subr.bf16.mxu0 %v2173_v25  ;;  %1698 = vmatprep.subr.bf16.mxu1 %v2175_v26  ;;  %v247_v25 = vld [vmem:[%s3195_s1 + $0x758] sm:$0xff]  ;;  %v2316_v26 = vcombine.low %v254_v13, %v262_v14  ;;  %v2301_v27 = vcombine.high %v238_v22, %v246_v23 }
  0x48   :  { %1687 = vmatprep.mubr.bf16.mxu0 %v2483_v3  ;;  %1728 = vmatprep.mubr.bf16.mxu1 %v2483_v3  ;;  %v2303_v28 = vcombine.high %v239_v24, %v247_v25  ;;  %v2302_v34 = vcombine.low %v239_v24, %v247_v25  ;;  %v112_v25 = vld [vmem:[%s3195_s1 + $0x320] sm:$0xff] }
  0x4a   :  { %1658 = vmatpush1.bf16.msra.mxu0 %v2172_v30  ;;  %1699 = vmatpush1.bf16.msra.mxu1 %v2174_v31  ;;  %v230_v30 = vld [vmem:[%s3195_s1 + $0x6d0] sm:$0xff]  ;;  %v223_v31 = vld [vmem:[%s3195_s1 + $0x698] sm:$0xff] }
  0x4b   :  { %1659 = vmatprep.subr.bf16.mxu0 %v2157_v32  ;;  %1700 = vmatprep.subr.bf16.mxu1 %v2159_v33  ;;  %v231_v32 = vld [vmem:[%s3195_s1 + $0x6d8] sm:$0xff]  ;;  %v2300_v33 = vcombine.low %v238_v22, %v246_v23  ;;  %v2285_v35 = vcombine.high %v222_v29, %v230_v30 }
  0x4c   :  { %v2287_v36 = vcombine.high %v223_v31, %v231_v32  ;;  %v2286_v42 = vcombine.low %v223_v31, %v231_v32  ;;  %v96_v32 = vld [vmem:[%s3195_s1 + $0x2a0] sm:$0xff] }
  0x4e   :  { %1660 = vmatpush1.bf16.msra.mxu0 %v2156_v38  ;;  %1701 = vmatpush1.bf16.msra.mxu1 %v2158_v39  ;;  %v214_v38 = vld [vmem:[%s3195_s1 + $0x650] sm:$0xff]  ;;  %v207_v39 = vld [vmem:[%s3195_s1 + $0x618] sm:$0xff] }
  0x4f   :  { %1661 = vmatprep.subr.bf16.mxu0 %v2141_v40  ;;  %1702 = vmatprep.subr.bf16.mxu1 %v2143_v41  ;;  %v215_v40 = vld [vmem:[%s3195_s1 + $0x658] sm:$0xff]  ;;  %v2284_v41 = vcombine.low %v222_v29, %v230_v30  ;;  %v2269_v43 = vcombine.high %v206_v37, %v214_v38 }
  0x50   :  { %v2271_v44 = vcombine.high %v207_v39, %v215_v40  ;;  %v2270_v50 = vcombine.low %v207_v39, %v215_v40  ;;  %v80_v40 = vld [vmem:[%s3195_s1 + $0x220] sm:$0xff] }
  0x52   :  { %1662 = vmatpush1.bf16.msra.mxu0 %v2140_v46  ;;  %1703 = vmatpush1.bf16.msra.mxu1 %v2142_v47  ;;  %v198_v46 = vld [vmem:[%s3195_s1 + $0x5d0] sm:$0xff]  ;;  %v191_v47 = vld [vmem:[%s3195_s1 + $0x598] sm:$0xff] }
  0x53   :  { %1663 = vmatprep.subr.bf16.mxu0 %v2125_v48  ;;  %1704 = vmatprep.subr.bf16.mxu1 %v2127_v49  ;;  %v199_v48 = vld [vmem:[%s3195_s1 + $0x5d8] sm:$0xff]  ;;  %v2268_v49 = vcombine.low %v206_v37, %v214_v38  ;;  %v2253_v51 = vcombine.high %v190_v45, %v198_v46 }
  0x54   :  { %v2255_v52 = vcombine.high %v191_v47, %v199_v48  ;;  %v2254_v60 = vcombine.low %v191_v47, %v199_v48  ;;  %v64_v48 = vld [vmem:[%s3195_s1 + $0x1a0] sm:$0xff] }
  0x56   :  { %1664 = vmatpush1.bf16.msra.mxu0 %v2124_v54  ;;  %1705 = vmatpush1.bf16.msra.mxu1 %v2126_v55  ;;  %v182_v54 = vld [vmem:[%s3195_s1 + $0x550] sm:$0xff]  ;;  %v175_v55 = vld [vmem:[%s3195_s1 + $0x518] sm:$0xff] }
  0x57   :  { %1665 = vmatprep.subr.bf16.mxu0 %v2109_v57  ;;  %1706 = vmatprep.subr.bf16.mxu1 %v2111_v58  ;;  %v183_v57 = vld [vmem:[%s3195_s1 + $0x558] sm:$0xff]  ;;  %v2252_v58 = vcombine.low %v190_v45, %v198_v46  ;;  %v2237_v61 = vcombine.high %v174_v53, %v182_v54 }
  0x58   :  { %v2239_v62 = vcombine.high %v175_v55, %v183_v57  ;;  %v2238_v5 = vcombine.low %v175_v55, %v183_v57  ;;  %v48_v57 = vld [vmem:[%s3195_s1 + $0x120] sm:$0xff] }
  0x5a   :  { %1666 = vmatpush1.bf16.msra.mxu0 %v2108_v0  ;;  %1707 = vmatpush1.bf16.msra.mxu1 %v2110_v1  ;;  %v166_v0 = vld [vmem:[%s3195_s1 + $0x4d0] sm:$0xff]  ;;  %v159_v1 = vld [vmem:[%s3195_s1 + $0x498] sm:$0xff] }
  0x5b   :  { %1667 = vmatprep.subr.bf16.mxu0 %v2093_v2  ;;  %1708 = vmatprep.subr.bf16.mxu1 %v2095_v4  ;;  %v167_v2 = vld [vmem:[%s3195_s1 + $0x4d8] sm:$0xff]  ;;  %v2236_v4 = vcombine.low %v174_v53, %v182_v54  ;;  %v2221_v6 = vcombine.high %v158_v63, %v166_v0 }
  0x5c   :  { %v2223_v7 = vcombine.high %v159_v1, %v167_v2  ;;  %v2222_v13 = vcombine.low %v159_v1, %v167_v2  ;;  %v32_v2 = vld [vmem:[%s3195_s1 + $0xa0] sm:$0xff] }
  0x5e   :  { %1668 = vmatpush1.bf16.msra.mxu0 %v2092_v9  ;;  %1709 = vmatpush1.bf16.msra.mxu1 %v2094_v10  ;;  %v150_v9 = vld [vmem:[%s3195_s1 + $0x450] sm:$0xff]  ;;  %v143_v10 = vld [vmem:[%s3195_s1 + $0x418] sm:$0xff] }
  0x5f   :  { %1669 = vmatprep.subr.bf16.mxu0 %v2077_v11  ;;  %1710 = vmatprep.subr.bf16.mxu1 %v2079_v12  ;;  %v151_v11 = vld [vmem:[%s3195_s1 + $0x458] sm:$0xff]  ;;  %v2220_v12 = vcombine.low %v158_v63, %v166_v0  ;;  %v2205_v14 = vcombine.high %v142_v8, %v150_v9 }
  0x60   :  { %v2207_v15 = vcombine.high %v143_v10, %v151_v11  ;;  %v2206_v22 = vcombine.low %v143_v10, %v151_v11  ;;  %v16_v11 = vld [vmem:[%s3195_s1 + $0x20] sm:$0xff] }
  0x62   :  { %1670 = vmatpush1.bf16.msra.mxu0 %v2076_v17  ;;  %1711 = vmatpush1.bf16.msra.mxu1 %v2078_v18  ;;  %v136_v17 = vld [vmem:[%s3195_s1 + $0x3e0] sm:$0xff]  ;;  %v129_v18 = vld [vmem:[%s3195_s1 + $0x3a8] sm:$0xff] }
  0x63   :  { %1671 = vmatprep.subr.bf16.mxu0 %v2317_v19  ;;  %1712 = vmatprep.subr.bf16.mxu1 %v2319_v21  ;;  %v137_v19 = vld [vmem:[%s3195_s1 + $0x3e8] sm:$0xff]  ;;  %v2204_v21 = vcombine.low %v142_v8, %v150_v9  ;;  %v2193_v23 = vcombine.high %v128_v16, %v136_v17 }
  0x64   :  { %v2195_v24 = vcombine.high %v129_v18, %v137_v19  ;;  %v2194_v29 = vcombine.low %v129_v18, %v137_v19  ;;  %v256_v19 = vld [vmem:[%s3195_s1 + $0x7a0] sm:$0xff] }
  0x66   :  { %1672 = vmatpush2.bf16.msra.mxu0 %v2316_v26  ;;  %1713 = vmatpush2.bf16.msra.mxu1 %v2318_v59  ;;  %v120_v26 = vld [vmem:[%s3195_s1 + $0x360] sm:$0xff]  ;;  %v113_v59 = vld [vmem:[%s3195_s1 + $0x328] sm:$0xff] }
  0x67   :  { %1673 = vmatprep.subr.bf16.mxu0 %v2301_v27  ;;  %1714 = vmatprep.subr.bf16.mxu1 %v2303_v28  ;;  %v121_v27 = vld [vmem:[%s3195_s1 + $0x368] sm:$0xff]  ;;  %v2192_v28 = vcombine.low %v128_v16, %v136_v17  ;;  %v2177_v30 = vcombine.high %v112_v25, %v120_v26 }
  0x68   :  { %v2179_v31 = vcombine.high %v113_v59, %v121_v27  ;;  %v2178_v37 = vcombine.low %v113_v59, %v121_v27  ;;  %v240_v27 = vld [vmem:[%s3195_s1 + $0x720] sm:$0xff] }
  0x6a   :  { %1674 = vmatpush2.bf16.msra.mxu0 %v2300_v33  ;;  %1715 = vmatpush2.bf16.msra.mxu1 %v2302_v34  ;;  %v104_v33 = vld [vmem:[%s3195_s1 + $0x2e0] sm:$0xff]  ;;  %v97_v34 = vld [vmem:[%s3195_s1 + $0x2a8] sm:$0xff] }
  0x6b   :  { %1675 = vmatprep.subr.bf16.mxu0 %v2285_v35  ;;  %1716 = vmatprep.subr.bf16.mxu1 %v2287_v36  ;;  %v105_v35 = vld [vmem:[%s3195_s1 + $0x2e8] sm:$0xff]  ;;  %v2176_v36 = vcombine.low %v112_v25, %v120_v26  ;;  %v2161_v38 = vcombine.high %v96_v32, %v104_v33 }
  0x6c   :  { %v2163_v39 = vcombine.high %v97_v34, %v105_v35  ;;  %v2162_v45 = vcombine.low %v97_v34, %v105_v35  ;;  %v224_v35 = vld [vmem:[%s3195_s1 + $0x6a0] sm:$0xff] }
  0x6e   :  { %1676 = vmatpush2.bf16.msra.mxu0 %v2284_v41  ;;  %1717 = vmatpush2.bf16.msra.mxu1 %v2286_v42  ;;  %v88_v41 = vld [vmem:[%s3195_s1 + $0x260] sm:$0xff]  ;;  %v81_v42 = vld [vmem:[%s3195_s1 + $0x228] sm:$0xff] }
  0x6f   :  { %1677 = vmatprep.subr.bf16.mxu0 %v2269_v43  ;;  %1718 = vmatprep.subr.bf16.mxu1 %v2271_v44  ;;  %v89_v43 = vld [vmem:[%s3195_s1 + $0x268] sm:$0xff]  ;;  %v2160_v44 = vcombine.low %v96_v32, %v104_v33  ;;  %v2145_v46 = vcombine.high %v80_v40, %v88_v41 }
  0x70   :  { %v2147_v47 = vcombine.high %v81_v42, %v89_v43  ;;  %v2146_v53 = vcombine.low %v81_v42, %v89_v43  ;;  %v208_v43 = vld [vmem:[%s3195_s1 + $0x620] sm:$0xff] }
  0x72   :  { %1678 = vmatpush2.bf16.msra.mxu0 %v2268_v49  ;;  %1719 = vmatpush2.bf16.msra.mxu1 %v2270_v50  ;;  %v72_v49 = vld [vmem:[%s3195_s1 + $0x1e0] sm:$0xff]  ;;  %v65_v50 = vld [vmem:[%s3195_s1 + $0x1a8] sm:$0xff] }
  0x73   :  { %1679 = vmatprep.subr.bf16.mxu0 %v2253_v51  ;;  %1720 = vmatprep.subr.bf16.mxu1 %v2255_v52  ;;  %v73_v51 = vld [vmem:[%s3195_s1 + $0x1e8] sm:$0xff]  ;;  %v2144_v52 = vcombine.low %v80_v40, %v88_v41  ;;  %v2129_v54 = vcombine.high %v64_v48, %v72_v49 }
  0x74   :  { %v2131_v55 = vcombine.high %v65_v50, %v73_v51  ;;  %v2130_v63 = vcombine.low %v65_v50, %v73_v51  ;;  %v192_v51 = vld [vmem:[%s3195_s1 + $0x5a0] sm:$0xff] }
  0x76   :  { %1680 = vmatpush2.bf16.msra.mxu0 %v2252_v58  ;;  %1721 = vmatpush2.bf16.msra.mxu1 %v2254_v60  ;;  %v56_v58 = vld [vmem:[%s3195_s1 + $0x160] sm:$0xff]  ;;  %v49_v60 = vld [vmem:[%s3195_s1 + $0x128] sm:$0xff] }
  0x77   :  { %1681 = vmatprep.subr.bf16.mxu0 %v2237_v61  ;;  %1722 = vmatprep.subr.bf16.mxu1 %v2239_v62  ;;  %v57_v61 = vld [vmem:[%s3195_s1 + $0x168] sm:$0xff]  ;;  %v2128_v62 = vcombine.low %v64_v48, %v72_v49  ;;  %v2113_v0 = vcombine.high %v48_v57, %v56_v58 }
  0x78   :  { %v2115_v1 = vcombine.high %v49_v60, %v57_v61  ;;  %v2114_v8 = vcombine.low %v49_v60, %v57_v61  ;;  %v176_v61 = vld [vmem:[%s3195_s1 + $0x520] sm:$0xff] }
  0x7a   :  { %1682 = vmatpush2.bf16.msra.mxu0 %v2236_v4  ;;  %1723 = vmatpush2.bf16.msra.mxu1 %v2238_v5  ;;  %v40_v4 = vld [vmem:[%s3195_s1 + $0xe0] sm:$0xff]  ;;  %v33_v5 = vld [vmem:[%s3195_s1 + $0xa8] sm:$0xff] }
  0x7b   :  { %1683 = vmatprep.subr.bf16.mxu0 %v2221_v6  ;;  %1724 = vmatprep.subr.bf16.mxu1 %v2223_v7  ;;  %v41_v6 = vld [vmem:[%s3195_s1 + $0xe8] sm:$0xff]  ;;  %v2112_v7 = vcombine.low %v48_v57, %v56_v58  ;;  %v2097_v9 = vcombine.high %v32_v2, %v40_v4 }
  0x7c   :  { %v2099_v10 = vcombine.high %v33_v5, %v41_v6  ;;  %v2098_v16 = vcombine.low %v33_v5, %v41_v6  ;;  %v160_v6 = vld [vmem:[%s3195_s1 + $0x4a0] sm:$0xff] }
  0x7e   :  { %1684 = vmatpush2.bf16.msra.mxu0 %v2220_v12  ;;  %1725 = vmatpush2.bf16.msra.mxu1 %v2222_v13  ;;  %v24_v12 = vld [vmem:[%s3195_s1 + $0x60] sm:$0xff]  ;;  %v17_v13 = vld [vmem:[%s3195_s1 + $0x28] sm:$0xff] }
  0x7f   :  { %1685 = vmatprep.subr.bf16.mxu0 %v2205_v14  ;;  %1726 = vmatprep.subr.bf16.mxu1 %v2207_v15  ;;  %v25_v14 = vld [vmem:[%s3195_s1 + $0x68] sm:$0xff]  ;;  %v2096_v15 = vcombine.low %v32_v2, %v40_v4  ;;  %v2081_v17 = vcombine.high %v16_v11, %v24_v12 }
  0x80   :  { %v2083_v18 = vcombine.high %v17_v13, %v25_v14  ;;  %v2082_v25 = vcombine.low %v17_v13, %v25_v14  ;;  %v144_v14 = vld [vmem:[%s3195_s1 + $0x420] sm:$0xff] }
  0x82   :  { %1686 = vmatpush2.bf16.msra.mxu0 %v2204_v21  ;;  %1727 = vmatpush2.bf16.msra.mxu1 %v2206_v22  ;;  %v264_v21 = vld [vmem:[%s3195_s1 + $0x7e0] sm:$0xff]  ;;  %v257_v22 = vld [vmem:[%s3195_s1 + $0x7a8] sm:$0xff] }
  0x83   :  { %1737 = vmatprep.subr.bf16.mxu0 %v2193_v23  ;;  %1778 = vmatprep.subr.bf16.mxu1 %v2195_v24  ;;  %v265_v23 = vld [vmem:[%s3195_s1 + $0x7e8] sm:$0xff]  ;;  %v2080_v24 = vcombine.low %v16_v11, %v24_v12  ;;  %v2321_v26 = vcombine.high %v256_v19, %v264_v21 }
  0x84   :  { %v2323_v59 = vcombine.high %v257_v22, %v265_v23  ;;  %v2322_v32 = vcombine.low %v257_v22, %v265_v23  ;;  %v130_v23 = vld [vmem:[%s3195_s1 + $0x3b0] sm:$0xff] }
  0x85   :  { %1688 = vmatmul.mubr.bf16.vlgmr.msra.gmra.mxu0 %v2603_v20  ;;  %1729 = vmatmul.mubr.bf16.vlgmr.msra.gmra.mxu1 %v2603_v20 }
  0x86   :  { %1738 = vmatpush1.bf16.msra.mxu0 %v2192_v28  ;;  %1779 = vmatpush1.bf16.msra.mxu1 %v2194_v29  ;;  %v248_v28 = vld [vmem:[%s3195_s1 + $0x760] sm:$0xff]  ;;  %v241_v29 = vld [vmem:[%s3195_s1 + $0x728] sm:$0xff] }
  0x87   :  { %1739 = vmatprep.subr.bf16.mxu0 %v2177_v30  ;;  %1780 = vmatprep.subr.bf16.mxu1 %v2179_v31  ;;  %v249_v30 = vld [vmem:[%s3195_s1 + $0x768] sm:$0xff]  ;;  %v2320_v31 = vcombine.low %v256_v19, %v264_v21  ;;  %v2305_v33 = vcombine.high %v240_v27, %v248_v28 }
  0x88   :  { %1769 = vmatprep.mubr.bf16.mxu0 %v2483_v3  ;;  %1810 = vmatprep.mubr.bf16.mxu1 %v2483_v3  ;;  %v2307_v34 = vcombine.high %v241_v29, %v249_v30  ;;  %v2306_v40 = vcombine.low %v241_v29, %v249_v30  ;;  %v114_v30 = vld [vmem:[%s3195_s1 + $0x330] sm:$0xff] }
  0x8a   :  { %1740 = vmatpush1.bf16.msra.mxu0 %v2176_v36  ;;  %1781 = vmatpush1.bf16.msra.mxu1 %v2178_v37  ;;  %v232_v36 = vld [vmem:[%s3195_s1 + $0x6e0] sm:$0xff]  ;;  %v225_v37 = vld [vmem:[%s3195_s1 + $0x6a8] sm:$0xff] }
  0x8b   :  { %1741 = vmatprep.subr.bf16.mxu0 %v2161_v38  ;;  %1782 = vmatprep.subr.bf16.mxu1 %v2163_v39  ;;  %v233_v38 = vld [vmem:[%s3195_s1 + $0x6e8] sm:$0xff]  ;;  %v2304_v39 = vcombine.low %v240_v27, %v248_v28  ;;  %v2289_v41 = vcombine.high %v224_v35, %v232_v36 }
  0x8c   :  { %v2291_v42 = vcombine.high %v225_v37, %v233_v38  ;;  %v2290_v48 = vcombine.low %v225_v37, %v233_v38  ;;  %v98_v38 = vld [vmem:[%s3195_s1 + $0x2b0] sm:$0xff] }
  0x8e   :  { %1742 = vmatpush1.bf16.msra.mxu0 %v2160_v44  ;;  %1783 = vmatpush1.bf16.msra.mxu1 %v2162_v45  ;;  %v216_v44 = vld [vmem:[%s3195_s1 + $0x660] sm:$0xff]  ;;  %v209_v45 = vld [vmem:[%s3195_s1 + $0x628] sm:$0xff] }
  0x8f   :  { %1743 = vmatprep.subr.bf16.mxu0 %v2145_v46  ;;  %1784 = vmatprep.subr.bf16.mxu1 %v2147_v47  ;;  %v217_v46 = vld [vmem:[%s3195_s1 + $0x668] sm:$0xff]  ;;  %v2288_v47 = vcombine.low %v224_v35, %v232_v36  ;;  %v2273_v49 = vcombine.high %v208_v43, %v216_v44 }
  0x90   :  { %v2275_v50 = vcombine.high %v209_v45, %v217_v46  ;;  %v2274_v57 = vcombine.low %v209_v45, %v217_v46  ;;  %v82_v46 = vld [vmem:[%s3195_s1 + $0x230] sm:$0xff] }
  0x92   :  { %1744 = vmatpush1.bf16.msra.mxu0 %v2144_v52  ;;  %1785 = vmatpush1.bf16.msra.mxu1 %v2146_v53  ;;  %v200_v52 = vld [vmem:[%s3195_s1 + $0x5e0] sm:$0xff]  ;;  %v193_v53 = vld [vmem:[%s3195_s1 + $0x5a8] sm:$0xff] }
  0x93   :  { %1745 = vmatprep.subr.bf16.mxu0 %v2129_v54  ;;  %1786 = vmatprep.subr.bf16.mxu1 %v2131_v55  ;;  %v201_v54 = vld [vmem:[%s3195_s1 + $0x5e8] sm:$0xff]  ;;  %v2272_v55 = vcombine.low %v208_v43, %v216_v44  ;;  %v2257_v58 = vcombine.high %v192_v51, %v200_v52 }
  0x94   :  { %v2259_v60 = vcombine.high %v193_v53, %v201_v54  ;;  %v2258_v2 = vcombine.low %v193_v53, %v201_v54  ;;  %v66_v54 = vld [vmem:[%s3195_s1 + $0x1b0] sm:$0xff] }
  0x96   :  { %1746 = vmatpush1.bf16.msra.mxu0 %v2128_v62  ;;  %1787 = vmatpush1.bf16.msra.mxu1 %v2130_v63  ;;  %v184_v62 = vld [vmem:[%s3195_s1 + $0x560] sm:$0xff]  ;;  %v177_v63 = vld [vmem:[%s3195_s1 + $0x528] sm:$0xff] }
  0x97   :  { %1747 = vmatprep.subr.bf16.mxu0 %v2113_v0  ;;  %1788 = vmatprep.subr.bf16.mxu1 %v2115_v1  ;;  %v185_v0 = vld [vmem:[%s3195_s1 + $0x568] sm:$0xff]  ;;  %v2256_v1 = vcombine.low %v192_v51, %v200_v52  ;;  %v2241_v4 = vcombine.high %v176_v61, %v184_v62 }
  0x98   :  { %v2243_v5 = vcombine.high %v177_v63, %v185_v0  ;;  %v2242_v11 = vcombine.low %v177_v63, %v185_v0  ;;  %v50_v63 = vld [vmem:[%s3195_s1 + $0x130] sm:$0xff] }
  0x99   :  { %v58_v0 = vld [vmem:[%s3195_s1 + $0x170] sm:$0xff] }
  0x9a   :  { %1748 = vmatpush1.bf16.msra.mxu0 %v2112_v7  ;;  %1789 = vmatpush1.bf16.msra.mxu1 %v2114_v8  ;;  %v168_v7 = vld [vmem:[%s3195_s1 + $0x4e0] sm:$0xff]  ;;  %v161_v8 = vld [vmem:[%s3195_s1 + $0x4a8] sm:$0xff] }
  0x9b   :  { %1749 = vmatprep.subr.bf16.mxu0 %v2097_v9  ;;  %1790 = vmatprep.subr.bf16.mxu1 %v2099_v10  ;;  %v169_v9 = vld [vmem:[%s3195_s1 + $0x4e8] sm:$0xff]  ;;  %v2240_v10 = vcombine.low %v176_v61, %v184_v62  ;;  %v2225_v12 = vcombine.high %v160_v6, %v168_v7 }
  0x9c   :  { %v2227_v13 = vcombine.high %v161_v8, %v169_v9  ;;  %v2226_v19 = vcombine.low %v161_v8, %v169_v9  ;;  %v34_v8 = vld [vmem:[%s3195_s1 + $0xb0] sm:$0xff] }
  0x9d   :  { %v42_v9 = vld [vmem:[%s3195_s1 + $0xf0] sm:$0xff] }
  0x9e   :  { %1750 = vmatpush1.bf16.msra.mxu0 %v2096_v15  ;;  %1791 = vmatpush1.bf16.msra.mxu1 %v2098_v16  ;;  %v152_v15 = vld [vmem:[%s3195_s1 + $0x460] sm:$0xff]  ;;  %v145_v16 = vld [vmem:[%s3195_s1 + $0x428] sm:$0xff] }
  0x9f   :  { %1751 = vmatprep.subr.bf16.mxu0 %v2081_v17  ;;  %1792 = vmatprep.subr.bf16.mxu1 %v2083_v18  ;;  %v153_v17 = vld [vmem:[%s3195_s1 + $0x468] sm:$0xff]  ;;  %v2224_v18 = vcombine.low %v160_v6, %v168_v7  ;;  %v2209_v21 = vcombine.high %v144_v14, %v152_v15  ;;  %v2117_v6 = vcombine.high %v50_v63, %v58_v0 }
  0xa0   :  { %v2211_v22 = vcombine.high %v145_v16, %v153_v17  ;;  %v2210_v27 = vcombine.low %v145_v16, %v153_v17  ;;  %v18_v16 = vld [vmem:[%s3195_s1 + $0x30] sm:$0xff] }
  0xa1   :  { %v26_v17 = vld [vmem:[%s3195_s1 + $0x70] sm:$0xff] }
  0xa2   :  { %1752 = vmatpush1.bf16.msra.mxu0 %v2080_v24  ;;  %1793 = vmatpush1.bf16.msra.mxu1 %v2082_v25  ;;  %v138_v24 = vld [vmem:[%s3195_s1 + $0x3f0] sm:$0xff]  ;;  %v131_v25 = vld [vmem:[%s3195_s1 + $0x3b8] sm:$0xff] }
  0xa3   :  { %1753 = vmatprep.subr.bf16.mxu0 %v2321_v26  ;;  %1794 = vmatprep.subr.bf16.mxu1 %v2323_v59  ;;  %v139_v26 = vld [vmem:[%s3195_s1 + $0x3f8] sm:$0xff]  ;;  %v2208_v59 = vcombine.low %v144_v14, %v152_v15  ;;  %v2197_v28 = vcombine.high %v130_v23, %v138_v24  ;;  %v2101_v14 = vcombine.high %v34_v8, %v42_v9 }
  0xa4   :  { %v2199_v29 = vcombine.high %v131_v25, %v139_v26  ;;  %v2198_v35 = vcombine.low %v131_v25, %v139_v26  ;;  %v258_v25 = vld [vmem:[%s3195_s1 + $0x7b0] sm:$0xff] }
  0xa5   :  { %v266_v26 = vld [vmem:[%s3195_s1 + $0x7f0] sm:$0xff] }
  0xa6   :  { %1754 = vmatpush2.bf16.msra.mxu0 %v2320_v31  ;;  %1795 = vmatpush2.bf16.msra.mxu1 %v2322_v32  ;;  %v122_v31 = vld [vmem:[%s3195_s1 + $0x370] sm:$0xff]  ;;  %v115_v32 = vld [vmem:[%s3195_s1 + $0x338] sm:$0xff] }
  0xa7   :  { %1755 = vmatprep.subr.bf16.mxu0 %v2305_v33  ;;  %1796 = vmatprep.subr.bf16.mxu1 %v2307_v34  ;;  %v123_v33 = vld [vmem:[%s3195_s1 + $0x378] sm:$0xff]  ;;  %v2196_v34 = vcombine.low %v130_v23, %v138_v24  ;;  %v2181_v36 = vcombine.high %v114_v30, %v122_v31  ;;  %v2085_v23 = vcombine.high %v18_v16, %v26_v17 }
  0xa8   :  { %v2183_v37 = vcombine.high %v115_v32, %v123_v33  ;;  %v2182_v43 = vcombine.low %v115_v32, %v123_v33  ;;  %v242_v32 = vld [vmem:[%s3195_s1 + $0x730] sm:$0xff] }
  0xa9   :  { %v250_v33 = vld [vmem:[%s3195_s1 + $0x770] sm:$0xff] }
  0xaa   :  { %1756 = vmatpush2.bf16.msra.mxu0 %v2304_v39  ;;  %1797 = vmatpush2.bf16.msra.mxu1 %v2306_v40  ;;  %v106_v39 = vld [vmem:[%s3195_s1 + $0x2f0] sm:$0xff]  ;;  %v99_v40 = vld [vmem:[%s3195_s1 + $0x2b8] sm:$0xff] }
  0xab   :  { %1757 = vmatprep.subr.bf16.mxu0 %v2289_v41  ;;  %1798 = vmatprep.subr.bf16.mxu1 %v2291_v42  ;;  %v107_v41 = vld [vmem:[%s3195_s1 + $0x2f8] sm:$0xff]  ;;  %v2180_v42 = vcombine.low %v114_v30, %v122_v31  ;;  %v2165_v44 = vcombine.high %v98_v38, %v106_v39  ;;  %v2325_v30 = vcombine.high %v258_v25, %v266_v26 }
  0xac   :  { %v2167_v45 = vcombine.high %v99_v40, %v107_v41  ;;  %v2166_v51 = vcombine.low %v99_v40, %v107_v41  ;;  %v226_v40 = vld [vmem:[%s3195_s1 + $0x6b0] sm:$0xff] }
  0xad   :  { %v234_v41 = vld [vmem:[%s3195_s1 + $0x6f0] sm:$0xff] }
  0xae   :  { %1758 = vmatpush2.bf16.msra.mxu0 %v2288_v47  ;;  %1799 = vmatpush2.bf16.msra.mxu1 %v2290_v48  ;;  %v90_v47 = vld [vmem:[%s3195_s1 + $0x270] sm:$0xff]  ;;  %v83_v48 = vld [vmem:[%s3195_s1 + $0x238] sm:$0xff] }
  0xaf   :  { %1759 = vmatprep.subr.bf16.mxu0 %v2273_v49  ;;  %1800 = vmatprep.subr.bf16.mxu1 %v2275_v50  ;;  %v91_v49 = vld [vmem:[%s3195_s1 + $0x278] sm:$0xff]  ;;  %v2164_v50 = vcombine.low %v98_v38, %v106_v39  ;;  %v2149_v52 = vcombine.high %v82_v46, %v90_v47  ;;  %v2309_v38 = vcombine.high %v242_v32, %v250_v33 }
  0xb0   :  { %v2151_v53 = vcombine.high %v83_v48, %v91_v49 }
  0xb2   :  { %1760 = vmatpush2.bf16.msra.mxu0 %v2272_v55  ;;  %1801 = vmatpush2.bf16.msra.mxu1 %v2274_v57  ;;  %v74_v55 = vld [vmem:[%s3195_s1 + $0x1f0] sm:$0xff]  ;;  %v75_v57 = vld [vmem:[%s3195_s1 + $0x1f8] sm:$0xff] }
  0xb3   :  { %1761 = vmatprep.subr.bf16.mxu0 %v2257_v58  ;;  %1802 = vmatprep.subr.bf16.mxu1 %v2259_v60  ;;  %v2148_v58 = vcombine.low %v82_v46, %v90_v47  ;;  %v2150_v60 = vcombine.low %v83_v48, %v91_v49  ;;  %v2133_v61 = vcombine.high %v66_v54, %v74_v55  ;;  %v210_v48 = vld [vmem:[%s3195_s1 + $0x630] sm:$0xff] }
  0xb4   :  { %v2293_v46 = vcombine.high %v226_v40, %v234_v41  ;;  %v218_v49 = vld [vmem:[%s3195_s1 + $0x670] sm:$0xff] }
  0xb6   :  { %1762 = vmatpush2.bf16.msra.mxu0 %v2256_v1  ;;  %1803 = vmatpush2.bf16.msra.mxu1 %v2258_v2  ;;  %v51_v1 = vld [vmem:[%s3195_s1 + $0x138] sm:$0xff] }
  0xb7   :  { %1763 = vmatprep.subr.bf16.mxu0 %v2241_v4  ;;  %1804 = vmatprep.subr.bf16.mxu1 %v2243_v5  ;;  %v59_v2 = vld [vmem:[%s3195_s1 + $0x178] sm:$0xff]  ;;  %v2132_v4 = vcombine.low %v66_v54, %v74_v55  ;;  %v2277_v54 = vcombine.high %v210_v48, %v218_v49 }
  0xb8   :  { %v2119_v7 = vcombine.high %v51_v1, %v59_v2 }
  0xba   :  { %1764 = vmatpush2.bf16.msra.mxu0 %v2240_v10  ;;  %1805 = vmatpush2.bf16.msra.mxu1 %v2242_v11  ;;  %v35_v10 = vld [vmem:[%s3195_s1 + $0xb8] sm:$0xff] }
  0xbb   :  { %1765 = vmatprep.subr.bf16.mxu0 %v2225_v12  ;;  %1806 = vmatprep.subr.bf16.mxu1 %v2227_v13  ;;  %v43_v11 = vld [vmem:[%s3195_s1 + $0xf8] sm:$0xff]  ;;  %v2116_v12 = vcombine.low %v50_v63, %v58_v0  ;;  %v2118_v13 = vcombine.low %v51_v1, %v59_v2  ;;  %v178_v1 = vld [vmem:[%s3195_s1 + $0x530] sm:$0xff] }
  0xbc   :  { %v2103_v15 = vcombine.high %v35_v10, %v43_v11  ;;  %v186_v2 = vld [vmem:[%s3195_s1 + $0x570] sm:$0xff] }
  0xbe   :  { %1766 = vmatpush2.bf16.msra.mxu0 %v2224_v18  ;;  %1807 = vmatpush2.bf16.msra.mxu1 %v2226_v19  ;;  %v19_v18 = vld [vmem:[%s3195_s1 + $0x38] sm:$0xff] }
  0xbf   :  { %1767 = vmatprep.subr.bf16.mxu0 %v2209_v21  ;;  %1808 = vmatprep.subr.bf16.mxu1 %v2211_v22  ;;  %v27_v19 = vld [vmem:[%s3195_s1 + $0x78] sm:$0xff]  ;;  %v2100_v21 = vcombine.low %v34_v8, %v42_v9  ;;  %v2102_v22 = vcombine.low %v35_v10, %v43_v11  ;;  %v2245_v8 = vcombine.high %v178_v1, %v186_v2  ;;  %v162_v10 = vld [vmem:[%s3195_s1 + $0x4b0] sm:$0xff] }
  0xc0   :  { %v2087_v24 = vcombine.high %v19_v18, %v27_v19  ;;  %v170_v11 = vld [vmem:[%s3195_s1 + $0x4f0] sm:$0xff] }
  0xc2   :  { %1768 = vmatpush2.bf16.msra.mxu0 %v2208_v59  ;;  %1809 = vmatpush2.bf16.msra.mxu1 %v2210_v27  ;;  %v259_v59 = vld [vmem:[%s3195_s1 + $0x7b8] sm:$0xff] }
  0xc3   :  { %1819 = vmatprep.subr.bf16.mxu0 %v2197_v28  ;;  %1860 = vmatprep.subr.bf16.mxu1 %v2199_v29  ;;  %v267_v27 = vld [vmem:[%s3195_s1 + $0x7f8] sm:$0xff]  ;;  %v2084_v28 = vcombine.low %v18_v16, %v26_v17  ;;  %v2086_v29 = vcombine.low %v19_v18, %v27_v19  ;;  %v2229_v16 = vcombine.high %v162_v10, %v170_v11  ;;  %v146_v18 = vld [vmem:[%s3195_s1 + $0x430] sm:$0xff] }
  0xc4   :  { %v2327_v31 = vcombine.high %v259_v59, %v267_v27  ;;  %v154_v19 = vld [vmem:[%s3195_s1 + $0x470] sm:$0xff] }
  0xc5   :  { %1770 = vmatmul.mubr.bf16.vlgmr.msra.gmra.mxu0 %v2603_v20  ;;  %1811 = vmatmul.mubr.bf16.vlgmr.msra.gmra.mxu1 %v2603_v20 }
  0xc6   :  { %1820 = vmatpush1.bf16.msra.mxu0 %v2196_v34  ;;  %1861 = vmatpush1.bf16.msra.mxu1 %v2198_v35  ;;  %v243_v34 = vld [vmem:[%s3195_s1 + $0x738] sm:$0xff] }
  0xc7   :  { %1821 = vmatprep.subr.bf16.mxu0 %v2181_v36  ;;  %1862 = vmatprep.subr.bf16.mxu1 %v2183_v37  ;;  %v251_v35 = vld [vmem:[%s3195_s1 + $0x778] sm:$0xff]  ;;  %v2324_v36 = vcombine.low %v258_v25, %v266_v26  ;;  %v2326_v37 = vcombine.low %v259_v59, %v267_v27  ;;  %v2213_v25 = vcombine.high %v146_v18, %v154_v19 }
  0xc8   :  { %1851 = vmatprep.mubr.bf16.mxu0 %v2483_v3  ;;  %1892 = vmatprep.mubr.bf16.mxu1 %v2483_v3  ;;  %v67_v3 = vld [vmem:[%s3195_s1 + $0x1b8] sm:$0xff]  ;;  %v2311_v39 = vcombine.high %v243_v34, %v251_v35  ;;  %v2212_v59 = vcombine.low %v146_v18, %v154_v19 }
  0xc9   :  { %v2135_v62 = vcombine.high %v67_v3, %v75_v57  ;;  %v2134_v5 = vcombine.low %v67_v3, %v75_v57  ;;  %v194_v3 = vld [vmem:[%s3195_s1 + $0x5b0] sm:$0xff] }
  0xca   :  { %1822 = vmatpush1.bf16.msra.mxu0 %v2180_v42  ;;  %1863 = vmatpush1.bf16.msra.mxu1 %v2182_v43  ;;  %v227_v42 = vld [vmem:[%s3195_s1 + $0x6b8] sm:$0xff]  ;;  %v202_v57 = vld [vmem:[%s3195_s1 + $0x5f0] sm:$0xff] }
  0xcb   :  { %1823 = vmatprep.subr.bf16.mxu0 %v2165_v44  ;;  %1864 = vmatprep.subr.bf16.mxu1 %v2167_v45  ;;  %v235_v43 = vld [vmem:[%s3195_s1 + $0x6f8] sm:$0xff]  ;;  %v2308_v44 = vcombine.low %v242_v32, %v250_v33  ;;  %v2310_v45 = vcombine.low %v243_v34, %v251_v35  ;;  %v2261_v63 = vcombine.high %v194_v3, %v202_v57 }
  0xcc   :  { %v2295_v47 = vcombine.high %v227_v42, %v235_v43 }
  0xce   :  { %1824 = vmatpush1.bf16.msra.mxu0 %v2164_v50  ;;  %1865 = vmatpush1.bf16.msra.mxu1 %v2166_v51  ;;  %v211_v50 = vld [vmem:[%s3195_s1 + $0x638] sm:$0xff] }
  0xcf   :  { %1825 = vmatprep.subr.bf16.mxu0 %v2149_v52  ;;  %1866 = vmatprep.subr.bf16.mxu1 %v2151_v53  ;;  %v219_v51 = vld [vmem:[%s3195_s1 + $0x678] sm:$0xff]  ;;  %v2292_v52 = vcombine.low %v226_v40, %v234_v41  ;;  %v2294_v53 = vcombine.low %v227_v42, %v235_v43 }
  0xd0   :  { %v2279_v55 = vcombine.high %v211_v50, %v219_v51 }
  0xd2   :  { %1826 = vmatpush1.bf16.msra.mxu0 %v2148_v58  ;;  %1867 = vmatpush1.bf16.msra.mxu1 %v2150_v60  ;;  %v195_v58 = vld [vmem:[%s3195_s1 + $0x5b8] sm:$0xff] }
  0xd3   :  { %1827 = vmatprep.subr.bf16.mxu0 %v2133_v61  ;;  %1868 = vmatprep.subr.bf16.mxu1 %v2135_v62  ;;  %v203_v60 = vld [vmem:[%s3195_s1 + $0x5f8] sm:$0xff]  ;;  %v2276_v61 = vcombine.low %v210_v48, %v218_v49  ;;  %v2278_v62 = vcombine.low %v211_v50, %v219_v51 }
  0xd4   :  { %v2263_v0 = vcombine.high %v195_v58, %v203_v60 }
  0xd6   :  { %1828 = vmatpush1.bf16.msra.mxu0 %v2132_v4  ;;  %1869 = vmatpush1.bf16.msra.mxu1 %v2134_v5  ;;  %v179_v4 = vld [vmem:[%s3195_s1 + $0x538] sm:$0xff] }
  0xd7   :  { %1829 = vmatprep.subr.bf16.mxu0 %v2117_v6  ;;  %1870 = vmatprep.subr.bf16.mxu1 %v2119_v7  ;;  %v187_v5 = vld [vmem:[%s3195_s1 + $0x578] sm:$0xff]  ;;  %v2260_v6 = vcombine.low %v194_v3, %v202_v57  ;;  %v2262_v7 = vcombine.low %v195_v58, %v203_v60 }
  0xd8   :  { %v2247_v9 = vcombine.high %v179_v4, %v187_v5 }
  0xda   :  { %1830 = vmatpush1.bf16.msra.mxu0 %v2116_v12  ;;  %1871 = vmatpush1.bf16.msra.mxu1 %v2118_v13  ;;  %v163_v12 = vld [vmem:[%s3195_s1 + $0x4b8] sm:$0xff] }
  0xdb   :  { %1831 = vmatprep.subr.bf16.mxu0 %v2101_v14  ;;  %1872 = vmatprep.subr.bf16.mxu1 %v2103_v15  ;;  %v171_v13 = vld [vmem:[%s3195_s1 + $0x4f8] sm:$0xff]  ;;  %v2244_v14 = vcombine.low %v178_v1, %v186_v2  ;;  %v2246_v15 = vcombine.low %v179_v4, %v187_v5 }
  0xdc   :  { %v2231_v17 = vcombine.high %v163_v12, %v171_v13 }
  0xde   :  { %1832 = vmatpush1.bf16.msra.mxu0 %v2100_v21  ;;  %1873 = vmatpush1.bf16.msra.mxu1 %v2102_v22  ;;  %v147_v21 = vld [vmem:[%s3195_s1 + $0x438] sm:$0xff] }
  0xdf   :  { %1833 = vmatprep.subr.bf16.mxu0 %v2085_v23  ;;  %1874 = vmatprep.subr.bf16.mxu1 %v2087_v24  ;;  %v155_v22 = vld [vmem:[%s3195_s1 + $0x478] sm:$0xff]  ;;  %v2228_v23 = vcombine.low %v162_v10, %v170_v11  ;;  %v2230_v24 = vcombine.low %v163_v12, %v171_v13 }
  0xe0   :  { %v2215_v26 = vcombine.high %v147_v21, %v155_v22  ;;  %v2214_v27 = vcombine.low %v147_v21, %v155_v22 }
  0xe2   :  { %1834 = vmatpush1.bf16.msra.mxu0 %v2084_v28  ;;  %1875 = vmatpush1.bf16.msra.mxu1 %v2086_v29 }
  0xe3   :  { %1835 = vmatprep.subr.bf16.mxu0 %v2325_v30  ;;  %1876 = vmatprep.subr.bf16.mxu1 %v2327_v31 }
  0xe6   :  { %1836 = vmatpush2.bf16.msra.mxu0 %v2324_v36  ;;  %1877 = vmatpush2.bf16.msra.mxu1 %v2326_v37 }
  0xe7   :  { %1837 = vmatprep.subr.bf16.mxu0 %v2309_v38  ;;  %1878 = vmatprep.subr.bf16.mxu1 %v2311_v39 }
  0xea   :  { %1838 = vmatpush2.bf16.msra.mxu0 %v2308_v44  ;;  %1879 = vmatpush2.bf16.msra.mxu1 %v2310_v45 }
  0xeb   :  { %1839 = vmatprep.subr.bf16.mxu0 %v2293_v46  ;;  %1880 = vmatprep.subr.bf16.mxu1 %v2295_v47 }
  0xee   :  { %1840 = vmatpush2.bf16.msra.mxu0 %v2292_v52  ;;  %1881 = vmatpush2.bf16.msra.mxu1 %v2294_v53 }
  0xef   :  { %1841 = vmatprep.subr.bf16.mxu0 %v2277_v54  ;;  %1882 = vmatprep.subr.bf16.mxu1 %v2279_v55 }
  0xf2   :  { %1842 = vmatpush2.bf16.msra.mxu0 %v2276_v61  ;;  %1883 = vmatpush2.bf16.msra.mxu1 %v2278_v62 }
  0xf3   :  { %1843 = vmatprep.subr.bf16.mxu0 %v2261_v63  ;;  %1884 = vmatprep.subr.bf16.mxu1 %v2263_v0 }
  0xf6   :  { %1844 = vmatpush2.bf16.msra.mxu0 %v2260_v6  ;;  %1885 = vmatpush2.bf16.msra.mxu1 %v2262_v7 }
  0xf7   :  { %1845 = vmatprep.subr.bf16.mxu0 %v2245_v8  ;;  %1886 = vmatprep.subr.bf16.mxu1 %v2247_v9 }
  0xfa   :  { %1846 = vmatpush2.bf16.msra.mxu0 %v2244_v14  ;;  %1887 = vmatpush2.bf16.msra.mxu1 %v2246_v15 }
  0xfb   :  { %1847 = vmatprep.subr.bf16.mxu0 %v2229_v16  ;;  %1888 = vmatprep.subr.bf16.mxu1 %v2231_v17 }
  0xfe   :  { %1848 = vmatpush2.bf16.msra.mxu0 %v2228_v23  ;;  %1889 = vmatpush2.bf16.msra.mxu1 %v2230_v24 }
  0xff   :  { %1849 = vmatprep.subr.bf16.mxu0 %v2213_v25  ;;  %1890 = vmatprep.subr.bf16.mxu1 %v2215_v26 }
 0x102   :  { %1850 = vmatpush2.bf16.msra.mxu0 %v2212_v59  ;;  %1891 = vmatpush2.bf16.msra.mxu1 %v2214_v27 }
 0x105   :  { %v1607_v28 = vpop.f32.mrf.mxu0  ;;  %1852 = vmatmul.mubr.bf16.vlgmr.msra.gmra.mxu0 %v2603_v20  ;;  %v1648_v29 = vpop.f32.mrf.mxu1  ;;  %1893 = vmatmul.mubr.bf16.vlgmr.msra.gmra.mxu1 %v2603_v20 }
 0x106   :  { %2329 = vtanh.f32 %v1607_v28 }
 0x107   :  { %2331 = vtanh.f32 %v1648_v29  ;;  %v1609_v30 = vpop.f32.mrf.mxu0  ;;  %v1650_v31 = vpop.f32.mrf.mxu1 }
 0x108   :  { %2333 = vtanh.f32 %v1609_v30 }
 0x109   :  { %2335 = vtanh.f32 %v1650_v31  ;;  %v1611_v32 = vpop.f32.mrf.mxu0  ;;  %v1652_v33 = vpop.f32.mrf.mxu1 }
 0x10b   :  { %v1612_v34 = vpop.f32.mrf.mxu0  ;;  %v1653_v35 = vpop.f32.mrf.mxu1 }
 0x113   :  { %v2330_v36 = vpop.eup %2329 }
 0x114   :  { %v2332_v37 = vpop.eup %2331  ;;  %v1917_v38 = vadd.f32 1.0, %v2330_v36 }
 0x115   :  { %v2334_v39 = vpop.eup %2333  ;;  %v1919_v40 = vadd.f32 1.0, %v2332_v37 }
 0x116   :  { %v2336_v41 = vpop.eup %2335  ;;  %v1933_v42 = vmul.f32 0.5, %v1917_v38  ;;  %v1918_v43 = vadd.f32 1.0, %v2334_v39 }
 0x117   :  { %v1935_v44 = vmul.f32 0.5, %v1919_v40  ;;  %v1920_v45 = vadd.f32 1.0, %v2336_v41 }
 0x118   :  { %v1934_v20 = vmul.f32 0.5, %v1918_v43 }
 0x119   :  { %v1936_v46 = vmul.f32 0.5, %v1920_v45 }
 0x11a   :  { %v1965_v47 = vcombine.low %v1933_v42, %v1934_v20 }
 0x11b   :  { %v1966_v48 = vcombine.low %v1935_v44, %v1936_v46 }
 0x11c   :  { %v1975_v49 = vrot.slane %v1965_v47, %v2461_v56 }
 0x11d   :  { %v1982_v50 = vrot.slane %v1966_v48, %v2461_v56 }
 0x11f   :  { %v1997_v51 = vcombine.low %v1975_v49, %v1982_v50 }
 0x121   :  { %v2005_v15 = vrot.slane %v1997_v51, %v2461_v56 }
 0x145   :  { %v1689_v52 = vpop.f32.mrf.mxu0  ;;  %v1730_v53 = vpop.f32.mrf.mxu1 }
 0x146   :  { %2337 = vtanh.f32 %v1689_v52 }
 0x147   :  { %2339 = vtanh.f32 %v1730_v53  ;;  %v1691_v54 = vpop.f32.mrf.mxu0  ;;  %v1732_v55 = vpop.f32.mrf.mxu1 }
 0x148   :  { %2341 = vtanh.f32 %v1691_v54 }
 0x149   :  { %2343 = vtanh.f32 %v1732_v55  ;;  %v1693_v3 = vpop.f32.mrf.mxu0  ;;  %v1734_v57 = vpop.f32.mrf.mxu1 }
 0x14b   :  { %v1694_v58 = vpop.f32.mrf.mxu0  ;;  %v1735_v60 = vpop.f32.mrf.mxu1 }
 0x153   :  { %v2338_v61 = vpop.eup %2337 }
 0x154   :  { %v2340_v62 = vpop.eup %2339  ;;  %v1921_v63 = vadd.f32 1.0, %v2338_v61 }
 0x155   :  { %v2342_v0 = vpop.eup %2341  ;;  %v1923_v1 = vadd.f32 1.0, %v2340_v62 }
 0x156   :  { %v2344_v2 = vpop.eup %2343  ;;  %v1937_v4 = vmul.f32 0.5, %v1921_v63  ;;  %v1922_v5 = vadd.f32 1.0, %v2342_v0 }
 0x157   :  { %v1939_v6 = vmul.f32 0.5, %v1923_v1  ;;  %v1924_v7 = vadd.f32 1.0, %v2344_v2 }
 0x158   :  { %v1938_v8 = vmul.f32 0.5, %v1922_v5 }
 0x159   :  { %v1940_v9 = vmul.f32 0.5, %v1924_v7 }
 0x15a   :  { %v1967_v10 = vcombine.low %v1937_v4, %v1938_v8 }
 0x15b   :  { %v1968_v11 = vcombine.low %v1939_v6, %v1940_v9 }
 0x15c   :  { %v1989_v12 = vrot.slane %v1967_v10, %v2461_v56 }
 0x15d   :  { %v1996_v13 = vrot.slane %v1968_v11, %v2461_v56 }
 0x15f   :  { %v1998_v14 = vcombine.low %v1989_v12, %v1996_v13 }
 0x161   :  { %v2012_v16 = vrot.slane %v1998_v14, %v2461_v56 }
 0x163   :  { %v2013_v17 = vcombine.low %v2005_v15, %v2012_v16 }
 0x165   :  { %2065 = vst [vmem:[%s3197_s2] sm:$0xff] %v2013_v17 }
 0x185   :  { %v1771_v18 = vpop.f32.mrf.mxu0  ;;  %v1812_v19 = vpop.f32.mrf.mxu1 }
 0x186   :  { %2345 = vtanh.f32 %v1771_v18 }
 0x187   :  { %2347 = vtanh.f32 %v1812_v19  ;;  %v1773_v21 = vpop.f32.mrf.mxu0  ;;  %v1814_v22 = vpop.f32.mrf.mxu1 }
 0x188   :  { %2349 = vtanh.f32 %v1773_v21 }
 0x189   :  { %2351 = vtanh.f32 %v1814_v22  ;;  %v1775_v23 = vpop.f32.mrf.mxu0  ;;  %v1816_v24 = vpop.f32.mrf.mxu1 }
 0x18b   :  { %v1776_v25 = vpop.f32.mrf.mxu0  ;;  %v1817_v26 = vpop.f32.mrf.mxu1 }
 0x193   :  { %v2346_v59 = vpop.eup %2345 }
 0x194   :  { %v2348_v27 = vpop.eup %2347  ;;  %v1925_v28 = vadd.f32 1.0, %v2346_v59 }
 0x195   :  { %v2350_v29 = vpop.eup %2349  ;;  %v1927_v30 = vadd.f32 1.0, %v2348_v27 }
 0x196   :  { %v2352_v31 = vpop.eup %2351  ;;  %v1941_v32 = vmul.f32 0.5, %v1925_v28  ;;  %v1926_v33 = vadd.f32 1.0, %v2350_v29 }
 0x197   :  { %v1943_v34 = vmul.f32 0.5, %v1927_v30  ;;  %v1928_v35 = vadd.f32 1.0, %v2352_v31 }
 0x198   :  { %v1942_v36 = vmul.f32 0.5, %v1926_v33 }
 0x199   :  { %v1944_v37 = vmul.f32 0.5, %v1928_v35 }
 0x19a   :  { %v2014_v38 = vcombine.low %v1941_v32, %v1942_v36 }
 0x19b   :  { %v2015_v39 = vcombine.low %v1943_v34, %v1944_v37 }
 0x19c   :  { %v2024_v40 = vrot.slane %v2014_v38, %v2461_v56 }
 0x19d   :  { %v2031_v41 = vrot.slane %v2015_v39, %v2461_v56 }
 0x19f   :  { %v2046_v42 = vcombine.low %v2024_v40, %v2031_v41 }
 0x1a1   :  { %v2054_v5 = vrot.slane %v2046_v42, %v2461_v56 }
 0x1c5   :  { %v1853_v43 = vpop.f32.mrf.mxu0  ;;  %v1894_v44 = vpop.f32.mrf.mxu1 }
 0x1c6   :  { %2353 = vtanh.f32 %v1853_v43 }
 0x1c7   :  { %2355 = vtanh.f32 %v1894_v44  ;;  %v1855_v45 = vpop.f32.mrf.mxu0  ;;  %v1896_v20 = vpop.f32.mrf.mxu1 }
 0x1c8   :  { %2357 = vtanh.f32 %v1855_v45 }
 0x1c9   :  { %2359 = vtanh.f32 %v1896_v20  ;;  %v1857_v46 = vpop.f32.mrf.mxu0  ;;  %v1898_v47 = vpop.f32.mrf.mxu1 }
 0x1cb   :  { %v1858_v48 = vpop.f32.mrf.mxu0  ;;  %v1899_v49 = vpop.f32.mrf.mxu1 }
 0x1d3   :  { %v2354_v50 = vpop.eup %2353 }
 0x1d4   :  { %v2356_v51 = vpop.eup %2355  ;;  %v1929_v52 = vadd.f32 1.0, %v2354_v50 }
 0x1d5   :  { %v2358_v53 = vpop.eup %2357  ;;  %v1931_v54 = vadd.f32 1.0, %v2356_v51 }
 0x1d6   :  { %v2360_v55 = vpop.eup %2359  ;;  %v1930_v3 = vadd.f32 1.0, %v2358_v53  ;;  %v1945_v58 = vmul.f32 0.5, %v1929_v52 }
 0x1d7   :  { %v1932_v57 = vadd.f32 1.0, %v2360_v55  ;;  %v1947_v61 = vmul.f32 0.5, %v1931_v54 }
 0x1d8   :  { %v1946_v60 = vmul.f32 0.5, %v1930_v3 }
 0x1d9   :  { %v1948_v62 = vmul.f32 0.5, %v1932_v57 }
 0x1da   :  { %v2016_v63 = vcombine.low %v1945_v58, %v1946_v60 }
 0x1db   :  { %v2017_v0 = vcombine.low %v1947_v61, %v1948_v62 }
 0x1dc   :  { %v2038_v1 = vrot.slane %v2016_v63, %v2461_v56 }
 0x1dd   :  { %v2045_v2 = vrot.slane %v2017_v0, %v2461_v56 }
 0x1df   :  { %v2047_v4 = vcombine.low %v2038_v1, %v2045_v2 }
 0x1e1   :  { %v2061_v6 = vrot.slane %v2047_v4, %v2461_v56 }
 0x1e3   :  { %v2062_v7 = vcombine.low %v2054_v5, %v2061_v6 }
 0x1e5   :  { %2066 = vst [vmem:[%s3197_s2 + $0x8] sm:$0xff] %v2062_v7 }

</bundles_post_ra>
